<compile_context>
chip_gen: v5e
topology: v5e:2x2
jax: 0.10.0
libtpu: 0.0.40
codegen_flags: <defaults>
</compile_context>

<pallas_src>
import jax
import jax.numpy as jnp
from jax.experimental import pallas as pl
from jax.experimental.pallas import tpu as pltpu

EMBEDDING_DIM = 20
HIDDEN_DIM_LSTM = 10
NUM_CLASSES = 10
VOCAB_SIZE = 16   # synthetic (module's word_to_ix is empty)
SEQ_LEN = 8

GATE_PAD = 128            # per-gate lane width (one vreg per gate block)
FUSED_W = 4 * GATE_PAD    # 512 lanes = i|f|g|o


def _ru8(x):
    return (x + 7) // 8 * 8


# Row offsets inside the packed constant slab (all sublane-tile aligned).
_R_EMBW = 0                                   # emb @ W_ih_fused : (V, 512)
_R_WHH = _R_EMBW + _ru8(VOCAB_SIZE)           # W_hh_fused       : (128, 512)
_R_B = _R_WHH + GATE_PAD                      # b_ih + b_hh      : (1, 512)
_R_WFC = _R_B + 8                             # W_fc             : (H, C)
_R_BFC = _R_WFC + _ru8(HIDDEN_DIM_LSTM)       # b_fc             : (1, C)
_SLAB_ROWS = _R_BFC + 8


def _lstm_classifier_kernel(tok_ref, params_ref, out_ref):
    H, HP, V, C, T = HIDDEN_DIM_LSTM, GATE_PAD, VOCAB_SIZE, NUM_CLASSES, SEQ_LEN

    # ---- static sub-views of the packed constant slab (free) --------------
    emb_w = params_ref[_R_EMBW:_R_EMBW + V, :]          # (V, 4HP)
    w_hh = params_ref[_R_WHH:_R_WHH + HP, :]            # (HP, 4HP)
    b = params_ref[_R_B:_R_B + 1, :]                    # (1, 4HP)

    # ---- in-kernel embedding lookup: one-hot @ (emb @ W_ih_fused) ---------
    tok = tok_ref[...]                                   # (T, 1) int32
    col = jax.lax.broadcasted_iota(jnp.int32, (T, V), 1)
    one_hot = (tok == col).astype(jnp.float32)           # (T, V)

    # All input-side gate pre-activations for every timestep in one MXU call.
    xw = jnp.dot(one_hot, emb_w,
                 preferred_element_type=jnp.float32) + b  # (T, 4HP)

    h = jnp.zeros((1, HP), jnp.float32)
    c = jnp.zeros((1, HP), jnp.float32)

    # T = 8 is static: fully unrolled recurrence, h/c stay in vregs.
    # Gate order is PyTorch's i, f, g, o; i/f/o columns were pre-scaled by 0.5
    # so sigmoid(x) == 0.5 * tanh(x/2) + 0.5 needs only the shared tanh below.
    for t in range(T):
        z = xw[t:t + 1, :] + jnp.dot(h, w_hh,
                                     preferred_element_type=jnp.float32)  # (1, 4HP)
        a = jnp.tanh(z)                                   # single EUP launch
        i_g = 0.5 * a[:, 0 * HP:1 * HP] + 0.5             # vreg-aligned picks
        f_g = 0.5 * a[:, 1 * HP:2 * HP] + 0.5
        g_g = a[:, 2 * HP:3 * HP]
        o_g = 0.5 * a[:, 3 * HP:4 * HP] + 0.5
        c = f_g * c + i_g * g_g
        h = o_g * jnp.tanh(c)                             # second EUP launch
        # (pad lanes stay exactly 0 in h/c: z_pad = 0 -> g_pad = 0, i/f/o_pad = 0.5)

    # y = fullyconnected(lstm_out[-1])  -> (1, 10)
    w_fc = params_ref[_R_WFC:_R_WFC + H, 0:C]             # (H, C)
    b_fc = params_ref[_R_BFC:_R_BFC + 1, 0:C]             # (1, C)
    out_ref[...] = (jnp.dot(h[:, :H], w_fc,
                            preferred_element_type=jnp.float32)
                    + b_fc)


def prepare_params(emb, w_ih, w_hh, b_ih, b_hh, w_fc, b_fc):
    """One-time, call-invariant packing (hoisted out of the forward path).

    emb: (V,E); w_ih: (4,E,H); w_hh: (4,H,H); b_ih/b_hh: (4,1,H);
    w_fc: (H,C); b_fc: (1,C).  Returns a single (SLAB_ROWS, 512) f32 slab.
    """
    H, E, C, HP = HIDDEN_DIM_LSTM, EMBEDDING_DIM, NUM_CLASSES, GATE_PAD
    b = (b_ih + b_hh).reshape(4, H)

    # Gate order i, f, g, o; pre-scale i/f/o by 0.5 for the tanh identity.
    scales = (0.5, 0.5, 1.0, 0.5)

    def col_pad(m, g):                       # (rows, H) -> (rows, HP), scaled
        return jnp.pad(m * scales[g], ((0, 0), (0, HP - H)))

    w_ih_f = jnp.concatenate([col_pad(w_ih[g], g) for g in range(4)], axis=1)      # (E, 4HP)
    w_hh_f = jnp.concatenate([col_pad(w_hh[g], g) for g in range(4)], axis=1)      # (H, 4HP)
    b_f = jnp.concatenate([col_pad(b[g:g + 1], g) for g in range(4)], axis=1)      # (1, 4HP)

    # Fold the embedding table through the (scaled) input weights:
    # row v of emb_w is the input-side gate pre-activation for token v.
    emb_w = jnp.dot(emb.astype(jnp.float32), w_ih_f,
                    precision=jax.lax.Precision.HIGHEST)                           # (V, 4HP)

    def row_block(m, rows):                  # pad to (rows, FUSED_W)
        return jnp.pad(m, ((0, rows - m.shape[0]), (0, FUSED_W - m.shape[1])))

    slab = jnp.concatenate([
        row_block(emb_w, _R_WHH - _R_EMBW),
        row_block(w_hh_f, GATE_PAD),
        row_block(b_f, _R_WFC - _R_B),
        row_block(w_fc, _R_BFC - _R_WFC),
        row_block(b_fc.reshape(1, C), _SLAB_ROWS - _R_BFC),
    ], axis=0).astype(jnp.float32)
    assert slab.shape == (_SLAB_ROWS, FUSED_W)
    return slab


def lstm_classifier_forward(tokens, packed_params):
    """tokens: (T,) int32; packed_params: output of prepare_params()."""
    tok2d = tokens.reshape(SEQ_LEN, 1).astype(jnp.int32)
    return pl.pallas_call(
        _lstm_classifier_kernel,
        out_shape=jax.ShapeDtypeStruct((1, NUM_CLASSES), jnp.float32),
        in_specs=[
            pl.BlockSpec(memory_space=pltpu.MemorySpace.VMEM),  # tokens (T,1) i32
            pl.BlockSpec(memory_space=pltpu.MemorySpace.VMEM),  # packed constants
        ],
        out_specs=pl.BlockSpec(memory_space=pltpu.MemorySpace.VMEM),
    )(tok2d, packed_params)


def _ref_forward(tokens, emb, w_ih, w_hh, b, w_fc, b_fc):
    # pure-JAX reference mirroring PyTorch nn.LSTM semantics (gate order i,f,g,o)
    h = jnp.zeros((1, HIDDEN_DIM_LSTM), jnp.float32)
    c = jnp.zeros((1, HIDDEN_DIM_LSTM), jnp.float32)
    x_seq = emb[tokens]
    for t in range(tokens.shape[0]):
        x = x_seq[t:t + 1]
        i_g = jax.nn.sigmoid(x @ w_ih[0] + h @ w_hh[0] + b[0])
        f_g = jax.nn.sigmoid(x @ w_ih[1] + h @ w_hh[1] + b[1])
        g_g = jnp.tanh(x @ w_ih[2] + h @ w_hh[2] + b[2])
        o_g = jax.nn.sigmoid(x @ w_ih[3] + h @ w_hh[3] + b[3])
        c = f_g * c + i_g * g_g
        h = o_g * jnp.tanh(c)
    return h @ w_fc + b_fc


if __name__ == "__main__":
    key = jax.random.PRNGKey(0)
    k_emb, k_wih, k_whh, k_bih, k_bhh, k_wfc, k_bfc, k_tok = jax.random.split(key, 8)

    E, H, V, C = EMBEDDING_DIM, HIDDEN_DIM_LSTM, VOCAB_SIZE, NUM_CLASSES
    bound = 1.0 / jnp.sqrt(jnp.float32(H))

    emb = jax.random.normal(k_emb, (V, E), jnp.float32)
    w_ih = jax.random.uniform(k_wih, (4, E, H), jnp.float32, -bound, bound)
    w_hh = jax.random.uniform(k_whh, (4, H, H), jnp.float32, -bound, bound)
    b_ih = jax.random.uniform(k_bih, (4, 1, H), jnp.float32, -bound, bound)
    b_hh = jax.random.uniform(k_bhh, (4, 1, H), jnp.float32, -bound, bound)
    b = b_ih + b_hh
    w_fc = jax.random.uniform(k_wfc, (H, C), jnp.float32, -bound, bound)
    b_fc = jax.random.uniform(k_bfc, (1, C), jnp.float32, -bound, bound)

    tokens = jax.random.randint(k_tok, (SEQ_LEN,), 0, V, jnp.int32)

    # One-time parameter packing (call-invariant; not on the per-call path).
    packed_params = jax.block_until_ready(
        prepare_params(emb, w_ih, w_hh, b_ih, b_hh, w_fc, b_fc))

    y = lstm_classifier_forward(tokens, packed_params)
    y = jax.block_until_ready(y)

    y_ref = _ref_forward(tokens, emb, w_ih, w_hh, b, w_fc, b_fc)
    assert y.shape == (1, NUM_CLASSES)
    assert jnp.allclose(y, y_ref, atol=1e-4, rtol=1e-4)

    print("KERNEL_OK")
</pallas_src>

<mosaic_0001>
module attributes {stable_mosaic.version = 11 : i64} {
  func.func @_lstm_classifier_kernel(%arg0: memref<8x1xi32, #tpu.memory_space<vmem>>, %arg1: memref<176x512xf32, #tpu.memory_space<vmem>>, %arg2: memref<1x10xf32, #tpu.memory_space<vmem>>) attributes {dimension_semantics = [], scalar_prefetch = 0 : i64, scratch_operands = 0 : i64, tpu.core_type = #tpu.core_type<tc>} {
    %c0 = arith.constant 0 : index
    %c0_0 = arith.constant 0 : index
    %0 = vector.load %arg1[%c0, %c0_0] : memref<176x512xf32, #tpu.memory_space<vmem>>, vector<16x512xf32>
    %c16 = arith.constant 16 : index
    %c0_1 = arith.constant 0 : index
    %1 = vector.load %arg1[%c16, %c0_1] : memref<176x512xf32, #tpu.memory_space<vmem>>, vector<128x512xf32>
    %c144 = arith.constant 144 : index
    %c0_2 = arith.constant 0 : index
    %2 = vector.load %arg1[%c144, %c0_2] : memref<176x512xf32, #tpu.memory_space<vmem>>, vector<1x512xf32>
    %c0_3 = arith.constant 0 : index
    %c0_4 = arith.constant 0 : index
    %3 = vector.load %arg0[%c0_3, %c0_4] : memref<8x1xi32, #tpu.memory_space<vmem>>, vector<8x1xi32>
    %4 = tpu.iota {dimensions = array<i32: 1>} : vector<8x16xi32>
    %5 = vector.broadcast %3 : vector<8x1xi32> to vector<8x16xi32>
    %6 = arith.cmpi eq, %5, %4 : vector<8x16xi32>
    %7 = arith.extui %6 : vector<8x16xi1> to vector<8x16xi32>
    %8 = arith.sitofp %7 : vector<8x16xi32> to vector<8x16xf32>
    %cst = arith.constant dense<0.000000e+00> : vector<8x512xf32>
    %9 = tpu.matmul %8, %0, %cst {dimension_numbers = #tpu.dot_dimension_numbers<[1], [0], [0], [1], [0, 0, 1, 1], [], []>} : vector<8x16xf32>, vector<16x512xf32>, vector<8x512xf32> -> vector<8x512xf32>
    %10 = vector.broadcast %2 : vector<1x512xf32> to vector<8x512xf32>
    %11 = arith.addf %9, %10 : vector<8x512xf32>
    %cst_5 = arith.constant 0.000000e+00 : f32
    %12 = vector.broadcast %cst_5 : f32 to vector<1x128xf32>
    %cst_6 = arith.constant 0.000000e+00 : f32
    %13 = vector.broadcast %cst_6 : f32 to vector<1x128xf32>
    %14 = vector.extract_strided_slice %11 {offsets = [0, 0], sizes = [1, 512], strides = [1, 1]} : vector<8x512xf32> to vector<1x512xf32>
    %cst_7 = arith.constant dense<0.000000e+00> : vector<1x512xf32>
    %15 = tpu.matmul %12, %1, %cst_7 {dimension_numbers = #tpu.dot_dimension_numbers<[1], [0], [0], [1], [0, 0, 1, 1], [], []>} : vector<1x128xf32>, vector<128x512xf32>, vector<1x512xf32> -> vector<1x512xf32>
    %16 = arith.addf %14, %15 : vector<1x512xf32>
    %17 = math.tanh %16 : vector<1x512xf32>
    %18 = vector.extract_strided_slice %17 {offsets = [0, 0], sizes = [1, 128], strides = [1, 1]} : vector<1x512xf32> to vector<1x128xf32>
    %cst_8 = arith.constant 5.000000e-01 : f32
    %19 = vector.broadcast %cst_8 : f32 to vector<1x128xf32>
    %20 = arith.mulf %19, %18 : vector<1x128xf32>
    %cst_9 = arith.constant 5.000000e-01 : f32
    %21 = vector.broadcast %cst_9 : f32 to vector<1x128xf32>
    %22 = arith.addf %20, %21 : vector<1x128xf32>
    %23 = vector.extract_strided_slice %17 {offsets = [0, 128], sizes = [1, 128], strides = [1, 1]} : vector<1x512xf32> to vector<1x128xf32>
    %cst_10 = arith.constant 5.000000e-01 : f32
    %24 = vector.broadcast %cst_10 : f32 to vector<1x128xf32>
    %25 = arith.mulf %24, %23 : vector<1x128xf32>
    %cst_11 = arith.constant 5.000000e-01 : f32
    %26 = vector.broadcast %cst_11 : f32 to vector<1x128xf32>
    %27 = arith.addf %25, %26 : vector<1x128xf32>
    %28 = vector.extract_strided_slice %17 {offsets = [0, 256], sizes = [1, 128], strides = [1, 1]} : vector<1x512xf32> to vector<1x128xf32>
    %29 = vector.extract_strided_slice %17 {offsets = [0, 384], sizes = [1, 128], strides = [1, 1]} : vector<1x512xf32> to vector<1x128xf32>
    %cst_12 = arith.constant 5.000000e-01 : f32
    %30 = vector.broadcast %cst_12 : f32 to vector<1x128xf32>
    %31 = arith.mulf %30, %29 : vector<1x128xf32>
    %cst_13 = arith.constant 5.000000e-01 : f32
    %32 = vector.broadcast %cst_13 : f32 to vector<1x128xf32>
    %33 = arith.addf %31, %32 : vector<1x128xf32>
    %34 = arith.mulf %27, %13 : vector<1x128xf32>
    %35 = arith.mulf %22, %28 : vector<1x128xf32>
    %36 = arith.addf %34, %35 : vector<1x128xf32>
    %37 = math.tanh %36 : vector<1x128xf32>
    %38 = arith.mulf %33, %37 : vector<1x128xf32>
    %39 = vector.extract_strided_slice %11 {offsets = [1, 0], sizes = [1, 512], strides = [1, 1]} : vector<8x512xf32> to vector<1x512xf32>
    %cst_14 = arith.constant dense<0.000000e+00> : vector<1x512xf32>
    %40 = tpu.matmul %38, %1, %cst_14 {dimension_numbers = #tpu.dot_dimension_numbers<[1], [0], [0], [1], [0, 0, 1, 1], [], []>} : vector<1x128xf32>, vector<128x512xf32>, vector<1x512xf32> -> vector<1x512xf32>
    %41 = arith.addf %39, %40 : vector<1x512xf32>
    %42 = math.tanh %41 : vector<1x512xf32>
    %43 = vector.extract_strided_slice %42 {offsets = [0, 0], sizes = [1, 128], strides = [1, 1]} : vector<1x512xf32> to vector<1x128xf32>
    %cst_15 = arith.constant 5.000000e-01 : f32
    %44 = vector.broadcast %cst_15 : f32 to vector<1x128xf32>
    %45 = arith.mulf %44, %43 : vector<1x128xf32>
    %cst_16 = arith.constant 5.000000e-01 : f32
    %46 = vector.broadcast %cst_16 : f32 to vector<1x128xf32>
    %47 = arith.addf %45, %46 : vector<1x128xf32>
    %48 = vector.extract_strided_slice %42 {offsets = [0, 128], sizes = [1, 128], strides = [1, 1]} : vector<1x512xf32> to vector<1x128xf32>
    %cst_17 = arith.constant 5.000000e-01 : f32
    %49 = vector.broadcast %cst_17 : f32 to vector<1x128xf32>
    %50 = arith.mulf %49, %48 : vector<1x128xf32>
    %cst_18 = arith.constant 5.000000e-01 : f32
    %51 = vector.broadcast %cst_18 : f32 to vector<1x128xf32>
    %52 = arith.addf %50, %51 : vector<1x128xf32>
    %53 = vector.extract_strided_slice %42 {offsets = [0, 256], sizes = [1, 128], strides = [1, 1]} : vector<1x512xf32> to vector<1x128xf32>
    %54 = vector.extract_strided_slice %42 {offsets = [0, 384], sizes = [1, 128], strides = [1, 1]} : vector<1x512xf32> to vector<1x128xf32>
    %cst_19 = arith.constant 5.000000e-01 : f32
    %55 = vector.broadcast %cst_19 : f32 to vector<1x128xf32>
    %56 = arith.mulf %55, %54 : vector<1x128xf32>
    %cst_20 = arith.constant 5.000000e-01 : f32
    %57 = vector.broadcast %cst_20 : f32 to vector<1x128xf32>
    %58 = arith.addf %56, %57 : vector<1x128xf32>
    %59 = arith.mulf %52, %36 : vector<1x128xf32>
    %60 = arith.mulf %47, %53 : vector<1x128xf32>
    %61 = arith.addf %59, %60 : vector<1x128xf32>
    %62 = math.tanh %61 : vector<1x128xf32>
    %63 = arith.mulf %58, %62 : vector<1x128xf32>
    %64 = vector.extract_strided_slice %11 {offsets = [2, 0], sizes = [1, 512], strides = [1, 1]} : vector<8x512xf32> to vector<1x512xf32>
    %cst_21 = arith.constant dense<0.000000e+00> : vector<1x512xf32>
    %65 = tpu.matmul %63, %1, %cst_21 {dimension_numbers = #tpu.dot_dimension_numbers<[1], [0], [0], [1], [0, 0, 1, 1], [], []>} : vector<1x128xf32>, vector<128x512xf32>, vector<1x512xf32> -> vector<1x512xf32>
    %66 = arith.addf %64, %65 : vector<1x512xf32>
    %67 = math.tanh %66 : vector<1x512xf32>
    %68 = vector.extract_strided_slice %67 {offsets = [0, 0], sizes = [1, 128], strides = [1, 1]} : vector<1x512xf32> to vector<1x128xf32>
    %cst_22 = arith.constant 5.000000e-01 : f32
    %69 = vector.broadcast %cst_22 : f32 to vector<1x128xf32>
    %70 = arith.mulf %69, %68 : vector<1x128xf32>
    %cst_23 = arith.constant 5.000000e-01 : f32
    %71 = vector.broadcast %cst_23 : f32 to vector<1x128xf32>
    %72 = arith.addf %70, %71 : vector<1x128xf32>
    %73 = vector.extract_strided_slice %67 {offsets = [0, 128], sizes = [1, 128], strides = [1, 1]} : vector<1x512xf32> to vector<1x128xf32>
    %cst_24 = arith.constant 5.000000e-01 : f32
    %74 = vector.broadcast %cst_24 : f32 to vector<1x128xf32>
    %75 = arith.mulf %74, %73 : vector<1x128xf32>
    %cst_25 = arith.constant 5.000000e-01 : f32
    %76 = vector.broadcast %cst_25 : f32 to vector<1x128xf32>
    %77 = arith.addf %75, %76 : vector<1x128xf32>
    %78 = vector.extract_strided_slice %67 {offsets = [0, 256], sizes = [1, 128], strides = [1, 1]} : vector<1x512xf32> to vector<1x128xf32>
    %79 = vector.extract_strided_slice %67 {offsets = [0, 384], sizes = [1, 128], strides = [1, 1]} : vector<1x512xf32> to vector<1x128xf32>
    %cst_26 = arith.constant 5.000000e-01 : f32
    %80 = vector.broadcast %cst_26 : f32 to vector<1x128xf32>
    %81 = arith.mulf %80, %79 : vector<1x128xf32>
    %cst_27 = arith.constant 5.000000e-01 : f32
    %82 = vector.broadcast %cst_27 : f32 to vector<1x128xf32>
    %83 = arith.addf %81, %82 : vector<1x128xf32>
    %84 = arith.mulf %77, %61 : vector<1x128xf32>
    %85 = arith.mulf %72, %78 : vector<1x128xf32>
    %86 = arith.addf %84, %85 : vector<1x128xf32>
    %87 = math.tanh %86 : vector<1x128xf32>
    %88 = arith.mulf %83, %87 : vector<1x128xf32>
    %89 = vector.extract_strided_slice %11 {offsets = [3, 0], sizes = [1, 512], strides = [1, 1]} : vector<8x512xf32> to vector<1x512xf32>
    %cst_28 = arith.constant dense<0.000000e+00> : vector<1x512xf32>
    %90 = tpu.matmul %88, %1, %cst_28 {dimension_numbers = #tpu.dot_dimension_numbers<[1], [0], [0], [1], [0, 0, 1, 1], [], []>} : vector<1x128xf32>, vector<128x512xf32>, vector<1x512xf32> -> vector<1x512xf32>
    %91 = arith.addf %89, %90 : vector<1x512xf32>
    %92 = math.tanh %91 : vector<1x512xf32>
    %93 = vector.extract_strided_slice %92 {offsets = [0, 0], sizes = [1, 128], strides = [1, 1]} : vector<1x512xf32> to vector<1x128xf32>
    %cst_29 = arith.constant 5.000000e-01 : f32
    %94 = vector.broadcast %cst_29 : f32 to vector<1x128xf32>
    %95 = arith.mulf %94, %93 : vector<1x128xf32>
    %cst_30 = arith.constant 5.000000e-01 : f32
    %96 = vector.broadcast %cst_30 : f32 to vector<1x128xf32>
    %97 = arith.addf %95, %96 : vector<1x128xf32>
    %98 = vector.extract_strided_slice %92 {offsets = [0, 128], sizes = [1, 128], strides = [1, 1]} : vector<1x512xf32> to vector<1x128xf32>
    %cst_31 = arith.constant 5.000000e-01 : f32
    %99 = vector.broadcast %cst_31 : f32 to vector<1x128xf32>
    %100 = arith.mulf %99, %98 : vector<1x128xf32>
    %cst_32 = arith.constant 5.000000e-01 : f32
    %101 = vector.broadcast %cst_32 : f32 to vector<1x128xf32>
    %102 = arith.addf %100, %101 : vector<1x128xf32>
    %103 = vector.extract_strided_slice %92 {offsets = [0, 256], sizes = [1, 128], strides = [1, 1]} : vector<1x512xf32> to vector<1x128xf32>
    %104 = vector.extract_strided_slice %92 {offsets = [0, 384], sizes = [1, 128], strides = [1, 1]} : vector<1x512xf32> to vector<1x128xf32>
    %cst_33 = arith.constant 5.000000e-01 : f32
    %105 = vector.broadcast %cst_33 : f32 to vector<1x128xf32>
    %106 = arith.mulf %105, %104 : vector<1x128xf32>
    %cst_34 = arith.constant 5.000000e-01 : f32
    %107 = vector.broadcast %cst_34 : f32 to vector<1x128xf32>
    %108 = arith.addf %106, %107 : vector<1x128xf32>
    %109 = arith.mulf %102, %86 : vector<1x128xf32>
    %110 = arith.mulf %97, %103 : vector<1x128xf32>
    %111 = arith.addf %109, %110 : vector<1x128xf32>
    %112 = math.tanh %111 : vector<1x128xf32>
    %113 = arith.mulf %108, %112 : vector<1x128xf32>
    %114 = vector.extract_strided_slice %11 {offsets = [4, 0], sizes = [1, 512], strides = [1, 1]} : vector<8x512xf32> to vector<1x512xf32>
    %cst_35 = arith.constant dense<0.000000e+00> : vector<1x512xf32>
    %115 = tpu.matmul %113, %1, %cst_35 {dimension_numbers = #tpu.dot_dimension_numbers<[1], [0], [0], [1], [0, 0, 1, 1], [], []>} : vector<1x128xf32>, vector<128x512xf32>, vector<1x512xf32> -> vector<1x512xf32>
    %116 = arith.addf %114, %115 : vector<1x512xf32>
    %117 = math.tanh %116 : vector<1x512xf32>
    %118 = vector.extract_strided_slice %117 {offsets = [0, 0], sizes = [1, 128], strides = [1, 1]} : vector<1x512xf32> to vector<1x128xf32>
    %cst_36 = arith.constant 5.000000e-01 : f32
    %119 = vector.broadcast %cst_36 : f32 to vector<1x128xf32>
    %120 = arith.mulf %119, %118 : vector<1x128xf32>
    %cst_37 = arith.constant 5.000000e-01 : f32
    %121 = vector.broadcast %cst_37 : f32 to vector<1x128xf32>
    %122 = arith.addf %120, %121 : vector<1x128xf32>
    %123 = vector.extract_strided_slice %117 {offsets = [0, 128], sizes = [1, 128], strides = [1, 1]} : vector<1x512xf32> to vector<1x128xf32>
    %cst_38 = arith.constant 5.000000e-01 : f32
    %124 = vector.broadcast %cst_38 : f32 to vector<1x128xf32>
    %125 = arith.mulf %124, %123 : vector<1x128xf32>
    %cst_39 = arith.constant 5.000000e-01 : f32
    %126 = vector.broadcast %cst_39 : f32 to vector<1x128xf32>
    %127 = arith.addf %125, %126 : vector<1x128xf32>
    %128 = vector.extract_strided_slice %117 {offsets = [0, 256], sizes = [1, 128], strides = [1, 1]} : vector<1x512xf32> to vector<1x128xf32>
    %129 = vector.extract_strided_slice %117 {offsets = [0, 384], sizes = [1, 128], strides = [1, 1]} : vector<1x512xf32> to vector<1x128xf32>
    %cst_40 = arith.constant 5.000000e-01 : f32
    %130 = vector.broadcast %cst_40 : f32 to vector<1x128xf32>
    %131 = arith.mulf %130, %129 : vector<1x128xf32>
    %cst_41 = arith.constant 5.000000e-01 : f32
    %132 = vector.broadcast %cst_41 : f32 to vector<1x128xf32>
    %133 = arith.addf %131, %132 : vector<1x128xf32>
    %134 = arith.mulf %127, %111 : vector<1x128xf32>
    %135 = arith.mulf %122, %128 : vector<1x128xf32>
    %136 = arith.addf %134, %135 : vector<1x128xf32>
    %137 = math.tanh %136 : vector<1x128xf32>
    %138 = arith.mulf %133, %137 : vector<1x128xf32>
    %139 = vector.extract_strided_slice %11 {offsets = [5, 0], sizes = [1, 512], strides = [1, 1]} : vector<8x512xf32> to vector<1x512xf32>
    %cst_42 = arith.constant dense<0.000000e+00> : vector<1x512xf32>
    %140 = tpu.matmul %138, %1, %cst_42 {dimension_numbers = #tpu.dot_dimension_numbers<[1], [0], [0], [1], [0, 0, 1, 1], [], []>} : vector<1x128xf32>, vector<128x512xf32>, vector<1x512xf32> -> vector<1x512xf32>
    %141 = arith.addf %139, %140 : vector<1x512xf32>
    %142 = math.tanh %141 : vector<1x512xf32>
    %143 = vector.extract_strided_slice %142 {offsets = [0, 0], sizes = [1, 128], strides = [1, 1]} : vector<1x512xf32> to vector<1x128xf32>
    %cst_43 = arith.constant 5.000000e-01 : f32
    %144 = vector.broadcast %cst_43 : f32 to vector<1x128xf32>
    %145 = arith.mulf %144, %143 : vector<1x128xf32>
    %cst_44 = arith.constant 5.000000e-01 : f32
    %146 = vector.broadcast %cst_44 : f32 to vector<1x128xf32>
    %147 = arith.addf %145, %146 : vector<1x128xf32>
    %148 = vector.extract_strided_slice %142 {offsets = [0, 128], sizes = [1, 128], strides = [1, 1]} : vector<1x512xf32> to vector<1x128xf32>
    %cst_45 = arith.constant 5.000000e-01 : f32
    %149 = vector.broadcast %cst_45 : f32 to vector<1x128xf32>
    %150 = arith.mulf %149, %148 : vector<1x128xf32>
    %cst_46 = arith.constant 5.000000e-01 : f32
    %151 = vector.broadcast %cst_46 : f32 to vector<1x128xf32>
    %152 = arith.addf %150, %151 : vector<1x128xf32>
    %153 = vector.extract_strided_slice %142 {offsets = [0, 256], sizes = [1, 128], strides = [1, 1]} : vector<1x512xf32> to vector<1x128xf32>
    %154 = vector.extract_strided_slice %142 {offsets = [0, 384], sizes = [1, 128], strides = [1, 1]} : vector<1x512xf32> to vector<1x128xf32>
    %cst_47 = arith.constant 5.000000e-01 : f32
    %155 = vector.broadcast %cst_47 : f32 to vector<1x128xf32>
    %156 = arith.mulf %155, %154 : vector<1x128xf32>
    %cst_48 = arith.constant 5.000000e-01 : f32
    %157 = vector.broadcast %cst_48 : f32 to vector<1x128xf32>
    %158 = arith.addf %156, %157 : vector<1x128xf32>
    %159 = arith.mulf %152, %136 : vector<1x128xf32>
    %160 = arith.mulf %147, %153 : vector<1x128xf32>
    %161 = arith.addf %159, %160 : vector<1x128xf32>
    %162 = math.tanh %161 : vector<1x128xf32>
    %163 = arith.mulf %158, %162 : vector<1x128xf32>
    %164 = vector.extract_strided_slice %11 {offsets = [6, 0], sizes = [1, 512], strides = [1, 1]} : vector<8x512xf32> to vector<1x512xf32>
    %cst_49 = arith.constant dense<0.000000e+00> : vector<1x512xf32>
    %165 = tpu.matmul %163, %1, %cst_49 {dimension_numbers = #tpu.dot_dimension_numbers<[1], [0], [0], [1], [0, 0, 1, 1], [], []>} : vector<1x128xf32>, vector<128x512xf32>, vector<1x512xf32> -> vector<1x512xf32>
    %166 = arith.addf %164, %165 : vector<1x512xf32>
    %167 = math.tanh %166 : vector<1x512xf32>
    %168 = vector.extract_strided_slice %167 {offsets = [0, 0], sizes = [1, 128], strides = [1, 1]} : vector<1x512xf32> to vector<1x128xf32>
    %cst_50 = arith.constant 5.000000e-01 : f32
    %169 = vector.broadcast %cst_50 : f32 to vector<1x128xf32>
    %170 = arith.mulf %169, %168 : vector<1x128xf32>
    %cst_51 = arith.constant 5.000000e-01 : f32
    %171 = vector.broadcast %cst_51 : f32 to vector<1x128xf32>
    %172 = arith.addf %170, %171 : vector<1x128xf32>
    %173 = vector.extract_strided_slice %167 {offsets = [0, 128], sizes = [1, 128], strides = [1, 1]} : vector<1x512xf32> to vector<1x128xf32>
    %cst_52 = arith.constant 5.000000e-01 : f32
    %174 = vector.broadcast %cst_52 : f32 to vector<1x128xf32>
    %175 = arith.mulf %174, %173 : vector<1x128xf32>
    %cst_53 = arith.constant 5.000000e-01 : f32
    %176 = vector.broadcast %cst_53 : f32 to vector<1x128xf32>
    %177 = arith.addf %175, %176 : vector<1x128xf32>
    %178 = vector.extract_strided_slice %167 {offsets = [0, 256], sizes = [1, 128], strides = [1, 1]} : vector<1x512xf32> to vector<1x128xf32>
    %179 = vector.extract_strided_slice %167 {offsets = [0, 384], sizes = [1, 128], strides = [1, 1]} : vector<1x512xf32> to vector<1x128xf32>
    %cst_54 = arith.constant 5.000000e-01 : f32
    %180 = vector.broadcast %cst_54 : f32 to vector<1x128xf32>
    %181 = arith.mulf %180, %179 : vector<1x128xf32>
    %cst_55 = arith.constant 5.000000e-01 : f32
    %182 = vector.broadcast %cst_55 : f32 to vector<1x128xf32>
    %183 = arith.addf %181, %182 : vector<1x128xf32>
    %184 = arith.mulf %177, %161 : vector<1x128xf32>
    %185 = arith.mulf %172, %178 : vector<1x128xf32>
    %186 = arith.addf %184, %185 : vector<1x128xf32>
    %187 = math.tanh %186 : vector<1x128xf32>
    %188 = arith.mulf %183, %187 : vector<1x128xf32>
    %189 = vector.extract_strided_slice %11 {offsets = [7, 0], sizes = [1, 512], strides = [1, 1]} : vector<8x512xf32> to vector<1x512xf32>
    %cst_56 = arith.constant dense<0.000000e+00> : vector<1x512xf32>
    %190 = tpu.matmul %188, %1, %cst_56 {dimension_numbers = #tpu.dot_dimension_numbers<[1], [0], [0], [1], [0, 0, 1, 1], [], []>} : vector<1x128xf32>, vector<128x512xf32>, vector<1x512xf32> -> vector<1x512xf32>
    %191 = arith.addf %189, %190 : vector<1x512xf32>
    %192 = math.tanh %191 : vector<1x512xf32>
    %193 = vector.extract_strided_slice %192 {offsets = [0, 0], sizes = [1, 128], strides = [1, 1]} : vector<1x512xf32> to vector<1x128xf32>
    %cst_57 = arith.constant 5.000000e-01 : f32
    %194 = vector.broadcast %cst_57 : f32 to vector<1x128xf32>
    %195 = arith.mulf %194, %193 : vector<1x128xf32>
    %cst_58 = arith.constant 5.000000e-01 : f32
    %196 = vector.broadcast %cst_58 : f32 to vector<1x128xf32>
    %197 = arith.addf %195, %196 : vector<1x128xf32>
    %198 = vector.extract_strided_slice %192 {offsets = [0, 128], sizes = [1, 128], strides = [1, 1]} : vector<1x512xf32> to vector<1x128xf32>
    %cst_59 = arith.constant 5.000000e-01 : f32
    %199 = vector.broadcast %cst_59 : f32 to vector<1x128xf32>
    %200 = arith.mulf %199, %198 : vector<1x128xf32>
    %cst_60 = arith.constant 5.000000e-01 : f32
    %201 = vector.broadcast %cst_60 : f32 to vector<1x128xf32>
    %202 = arith.addf %200, %201 : vector<1x128xf32>
    %203 = vector.extract_strided_slice %192 {offsets = [0, 256], sizes = [1, 128], strides = [1, 1]} : vector<1x512xf32> to vector<1x128xf32>
    %204 = vector.extract_strided_slice %192 {offsets = [0, 384], sizes = [1, 128], strides = [1, 1]} : vector<1x512xf32> to vector<1x128xf32>
    %cst_61 = arith.constant 5.000000e-01 : f32
    %205 = vector.broadcast %cst_61 : f32 to vector<1x128xf32>
    %206 = arith.mulf %205, %204 : vector<1x128xf32>
    %cst_62 = arith.constant 5.000000e-01 : f32
    %207 = vector.broadcast %cst_62 : f32 to vector<1x128xf32>
    %208 = arith.addf %206, %207 : vector<1x128xf32>
    %209 = arith.mulf %202, %186 : vector<1x128xf32>
    %210 = arith.mulf %197, %203 : vector<1x128xf32>
    %211 = arith.addf %209, %210 : vector<1x128xf32>
    %212 = math.tanh %211 : vector<1x128xf32>
    %213 = arith.mulf %208, %212 : vector<1x128xf32>
    %c152 = arith.constant 152 : index
    %c0_63 = arith.constant 0 : index
    %214 = vector.load %arg1[%c152, %c0_63] : memref<176x512xf32, #tpu.memory_space<vmem>>, vector<10x10xf32>
    %c168 = arith.constant 168 : index
    %c0_64 = arith.constant 0 : index
    %215 = vector.load %arg1[%c168, %c0_64] : memref<176x512xf32, #tpu.memory_space<vmem>>, vector<1x10xf32>
    %216 = vector.extract_strided_slice %213 {offsets = [0, 0], sizes = [1, 10], strides = [1, 1]} : vector<1x128xf32> to vector<1x10xf32>
    %cst_65 = arith.constant dense<0.000000e+00> : vector<1x10xf32>
    %217 = tpu.matmul %216, %214, %cst_65 {dimension_numbers = #tpu.dot_dimension_numbers<[1], [0], [0], [1], [0, 0, 1, 1], [], []>} : vector<1x10xf32>, vector<10x10xf32>, vector<1x10xf32> -> vector<1x10xf32>
    %218 = arith.addf %217, %215 : vector<1x10xf32>
    %c0_66 = arith.constant 0 : index
    %c0_67 = arith.constant 0 : index
    %219 = vector.load %arg2[%c0_66, %c0_67] : memref<1x10xf32, #tpu.memory_space<vmem>>, vector<1x10xf32>
    tpu.vector_store %arg2[%c0_66, %c0_67], %218 {strides = array<i32>} : memref<1x10xf32, #tpu.memory_space<vmem>>, vector<1x10xf32>,
    return
  }
}

</mosaic_0001>

<bundles_post_ra>
// kernel: tpu_custom_call.1
= control target key start
LH: loop header
LB: loop body
LE: loop exit
PB: predicated region body
PF: predicated region fallthrough
CT: control target
= control target key end

     0   :  { %7 = vsyncpa [#allocation3], 0  ;;  %s2238_s0 = inlined_call_operand.vmem [shape: s32[8,1], index: 0, kind: input, shape index: {}]   ;;  %s2239_s1 = inlined_call_operand.hbm [shape: f32[176,512], index: 1, kind: input, shape index: {}]   ;;  %s2240_s2 = inlined_call_operand.hbm [shape: f32[1,10], index: 2, kind: output, shape index: {}]  }
   0x1   :  { %8 = vsyncpa [#allocation4], 0  ;;  %s15_s11 = sshll.u32 %s2239_s1, 4  ;;  %s1380_s12 = smov [#allocation2]   ;;  %s16_s11 = int_to_ptr.hbm [resolvable:$true] %s15_s11 }
   0x2   :  { %s17_s13 = sshll.u32 %s1380_s12, 4  ;;  %s1381_s14 = smov 512   ;;  %s18_s13 = int_to_ptr.vmem [resolvable:$true] %s17_s13 }
   0x3   :  { %s1382_s15 = smov 32  }
   0x4   :  { %23 = dma.hbm_to_vmem [thread:$0]  %s16_s11, 11264, %s18_s13, [#allocation3], %s1381_s14, %s1381_s14, %s1382_s15  }
   0x5   :  { %1376 = dma.done.wait [#allocation3], 11264  }
   0x6   :  { %1377 = vsyncadd [#allocation3], 4294956032  ;;  %v1383_v0 = vmov 0   ;;  %v102_v1 = vld [vmem:[%s2238_s0] sm:$0xff]  ;;  %v33_v3 = vld [vmem:[#allocation2 + $0x28] sm:$0xff]  ;;  %vm120_vm0 = vcmask 130048  }
   0x7   :  { %1183 = vset.pattern.permute.xlu0 %v1383_v0  ;;  %v32_v2 = vld [vmem:[#allocation2 + $0x20] sm:$0xff]  ;;  %v34_v4 = vld [vmem:[#allocation2 + $0x30] sm:$0xff]  ;;  %v35_v5 = vld [vmem:[#allocation2 + $0x38] sm:$0xff]  ;;  %158 = vmatpush.msra.mxu1 %v33_v3  ;;  %vm1127_vm2 = vcmask 1041408   ;;  %vm1124_vm3 = vcmask 80896   ;;  %s1385_s0 = smov [#allocation5]  }
   0x8   :  { %106 = vperm.xlu0 %1183, %v102_v1   ;;  %138 = vmatpush.msra.mxu0 %v32_v2  ;;  %v28_v6 = vld [vmem:[#allocation2] sm:$0xff]  ;;  %v29_v7 = vld [vmem:[#allocation2 + $0x8] sm:$0xff]  ;;  %v30_v8 = vld [vmem:[#allocation2 + $0x10] sm:$0xff]  ;;  %s1158_s1 = sshll.u32 %s1385_s0, 4  ;;  %s1160_s20 = sshll.u32 %s2240_s2, 4  ;;  %vm1151_vm4 = vcmask 73728   ;;  %s1159_s1 = int_to_ptr.vmem [resolvable:$true] %s1158_s1  ;;  %s1161_s20 = int_to_ptr.hbm [resolvable:$true] %s1160_s20 }
   0x9   :  { %178 = vmatpush.msra.mxu2 %v34_v4  ;;  %v31_v9 = vld [vmem:[#allocation2 + $0x18] sm:$0xff]  ;;  %198 = vmatpush.msra.mxu3 %v35_v5  ;;  %v1407_v10 = vld [vmem:[#allocation2 + $0x220] sm:$0xff]  ;;  %v1409_v11 = vld [vmem:[#allocation2 + $0x228] sm:$0xff] }
   0xa   :  { %139 = vmatpush.msra.mxu0 %v28_v6  ;;  %v1411_v12 = vld [vmem:[#allocation2 + $0x230] sm:$0xff]  ;;  %159 = vmatpush.msra.mxu1 %v29_v7  ;;  %v1413_v13 = vld [vmem:[#allocation2 + $0x238] sm:$0xff]  ;;  %v1415_v14 = vld [vmem:[#allocation2 + $0x200] sm:$0xff] }
   0xb   :  { %179 = vmatpush.msra.mxu2 %v30_v8  ;;  %199 = vmatpush.msra.mxu3 %v31_v9  ;;  %v1418_v15 = vld [vmem:[#allocation2 + $0x208] sm:$0xff]  ;;  %v1420_v16 = vld [vmem:[#allocation2 + $0x210] sm:$0xff]  ;;  %v1424_v17 = vld [vmem:[#allocation2 + $0x218] sm:$0xff] }
   0xc   :  { %204 = vmatpush.msrb.mxu0 %v1407_v10  ;;  %224 = vmatpush.msrb.mxu1 %v1409_v11  ;;  %v1426_v18 = vld [vmem:[#allocation2 + $0x1e0] sm:$0xff]  ;;  %v1430_v19 = vld [vmem:[#allocation2 + $0x1e8] sm:$0xff]  ;;  %v1432_v20 = vld [vmem:[#allocation2 + $0x1f0] sm:$0xff] }
   0xd   :  { %244 = vmatpush.msrb.mxu2 %v1411_v12  ;;  %264 = vmatpush.msrb.mxu3 %v1413_v13  ;;  %v1436_v21 = vld [vmem:[#allocation2 + $0x1f8] sm:$0xff]  ;;  %v1438_v22 = vld [vmem:[#allocation2 + $0x1c0] sm:$0xff]  ;;  %v1442_v23 = vld [vmem:[#allocation2 + $0x1c8] sm:$0xff] }
   0xe   :  { %205 = vmatpush.msrb.mxu0 %v1415_v14  ;;  %225 = vmatpush.msrb.mxu1 %v1418_v15  ;;  %v1444_v24 = vld [vmem:[#allocation2 + $0x1d0] sm:$0xff]  ;;  %v1448_v25 = vld [vmem:[#allocation2 + $0x1d8] sm:$0xff]  ;;  %v1450_v26 = vld [vmem:[#allocation2 + $0x1a0] sm:$0xff] }
   0xf   :  { %245 = vmatpush.msrb.mxu2 %v1420_v16  ;;  %265 = vmatpush.msrb.mxu3 %v1424_v17  ;;  %v1454_v27 = vld [vmem:[#allocation2 + $0x1a8] sm:$0xff]  ;;  %v1456_v28 = vld [vmem:[#allocation2 + $0x1b0] sm:$0xff]  ;;  %v1460_v29 = vld [vmem:[#allocation2 + $0x1b8] sm:$0xff] }
  0x10   :  { %206 = vmatpush.msrb.mxu0 %v1426_v18  ;;  %226 = vmatpush.msrb.mxu1 %v1430_v19  ;;  %v1462_v30 = vld [vmem:[#allocation2 + $0x180] sm:$0xff]  ;;  %v1466_v31 = vld [vmem:[#allocation2 + $0x188] sm:$0xff]  ;;  %v1468_v32 = vld [vmem:[#allocation2 + $0x190] sm:$0xff] }
  0x11   :  { %246 = vmatpush.msrb.mxu2 %v1432_v20  ;;  %266 = vmatpush.msrb.mxu3 %v1436_v21  ;;  %v1472_v33 = vld [vmem:[#allocation2 + $0x198] sm:$0xff]  ;;  %v1474_v34 = vld [vmem:[#allocation2 + $0x160] sm:$0xff]  ;;  %v1478_v35 = vld [vmem:[#allocation2 + $0x168] sm:$0xff] }
  0x12   :  { %207 = vmatpush.msrb.mxu0 %v1438_v22  ;;  %227 = vmatpush.msrb.mxu1 %v1442_v23  ;;  %v1480_v36 = vld [vmem:[#allocation2 + $0x170] sm:$0xff]  ;;  %v1484_v37 = vld [vmem:[#allocation2 + $0x178] sm:$0xff]  ;;  %v1486_v38 = vld [vmem:[#allocation2 + $0x140] sm:$0xff] }
  0x13   :  { %247 = vmatpush.msrb.mxu2 %v1444_v24  ;;  %267 = vmatpush.msrb.mxu3 %v1448_v25  ;;  %v1490_v39 = vld [vmem:[#allocation2 + $0x148] sm:$0xff]  ;;  %v1492_v40 = vld [vmem:[#allocation2 + $0x150] sm:$0xff]  ;;  %v1496_v41 = vld [vmem:[#allocation2 + $0x158] sm:$0xff] }
  0x14   :  { %208 = vmatpush.msrb.mxu0 %v1450_v26  ;;  %228 = vmatpush.msrb.mxu1 %v1454_v27  ;;  %v1498_v42 = vld [vmem:[#allocation2 + $0x120] sm:$0xff]  ;;  %v1502_v43 = vld [vmem:[#allocation2 + $0x128] sm:$0xff]  ;;  %v1504_v44 = vld [vmem:[#allocation2 + $0x130] sm:$0xff] }
  0x15   :  { %248 = vmatpush.msrb.mxu2 %v1456_v28  ;;  %268 = vmatpush.msrb.mxu3 %v1460_v29  ;;  %v1508_v45 = vld [vmem:[#allocation2 + $0x138] sm:$0xff]  ;;  %v1510_v46 = vld [vmem:[#allocation2 + $0x100] sm:$0xff]  ;;  %v1514_v47 = vld [vmem:[#allocation2 + $0x108] sm:$0xff] }
  0x16   :  { %209 = vmatpush.msrb.mxu0 %v1462_v30  ;;  %229 = vmatpush.msrb.mxu1 %v1466_v31  ;;  %v1516_v48 = vld [vmem:[#allocation2 + $0x110] sm:$0xff]  ;;  %v1520_v49 = vld [vmem:[#allocation2 + $0x118] sm:$0xff]  ;;  %v1527_v50 = vld [vmem:[#allocation2 + $0xe0] sm:$0xff] }
  0x17   :  { %249 = vmatpush.msrb.mxu2 %v1468_v32  ;;  %269 = vmatpush.msrb.mxu3 %v1472_v33  ;;  %v1529_v51 = vld [vmem:[#allocation2 + $0xe8] sm:$0xff]  ;;  %v1531_v52 = vld [vmem:[#allocation2 + $0xf0] sm:$0xff]  ;;  %v1535_v53 = vld [vmem:[#allocation2 + $0xf8] sm:$0xff] }
  0x18   :  { %210 = vmatpush.msrb.mxu0 %v1474_v34  ;;  %230 = vmatpush.msrb.mxu1 %v1478_v35  ;;  %v1539_v54 = vld [vmem:[#allocation2 + $0xc0] sm:$0xff]  ;;  %v1541_v55 = vld [vmem:[#allocation2 + $0xc8] sm:$0xff]  ;;  %v1543_v56 = vld [vmem:[#allocation2 + $0xd0] sm:$0xff] }
  0x19   :  { %250 = vmatpush.msrb.mxu2 %v1480_v36  ;;  %270 = vmatpush.msrb.mxu3 %v1484_v37  ;;  %2317 = vst [vmem:[#allocation8_spill] sm:$0xff] %v1539_v54  ;;  %v1547_v57 = vld [vmem:[#allocation2 + $0xd8] sm:$0xff]  ;;  %v1551_v58 = vld [vmem:[#allocation2 + $0xa0] sm:$0xff]  ;;  %v1553_v59 = vld [vmem:[#allocation2 + $0xa8] sm:$0xff] }
  0x1a   :  { %211 = vmatpush.msrb.mxu0 %v1486_v38  ;;  %231 = vmatpush.msrb.mxu1 %v1490_v39  ;;  %2318 = vst [vmem:[#allocation9_spill] sm:$0xff] %v1541_v55  ;;  %v1555_v60 = vld [vmem:[#allocation2 + $0xb0] sm:$0xff]  ;;  %v1559_v61 = vld [vmem:[#allocation2 + $0xb8] sm:$0xff]  ;;  %v1561_v62 = vld [vmem:[#allocation2 + $0x80] sm:$0xff] }
  0x1b   :  { %251 = vmatpush.msrb.mxu2 %v1492_v40  ;;  %271 = vmatpush.msrb.mxu3 %v1496_v41  ;;  %2319 = vst [vmem:[#allocation10_spill] sm:$0xff] %v1543_v56  ;;  %v1563_v63 = vld [vmem:[#allocation2 + $0x88] sm:$0xff]  ;;  %v1567_v0 = vld [vmem:[#allocation2 + $0x90] sm:$0xff]  ;;  %v1569_v1 = vld [vmem:[#allocation2 + $0x98] sm:$0xff] }
  0x1c   :  { %212 = vmatpush.msrb.mxu0 %v1498_v42  ;;  %232 = vmatpush.msrb.mxu1 %v1502_v43  ;;  %2320 = vst [vmem:[#allocation11_spill] sm:$0xff] %v1547_v57  ;;  %v1571_v2 = vld [vmem:[#allocation2 + $0x60] sm:$0xff]  ;;  %v1575_v3 = vld [vmem:[#allocation2 + $0x68] sm:$0xff]  ;;  %v1577_v4 = vld [vmem:[#allocation2 + $0x70] sm:$0xff] }
  0x1d   :  { %252 = vmatpush.msrb.mxu2 %v1504_v44  ;;  %272 = vmatpush.msrb.mxu3 %v1508_v45  ;;  %2321 = vst [vmem:[#allocation12_spill] sm:$0xff] %v1551_v58  ;;  %v1579_v5 = vld [vmem:[#allocation2 + $0x78] sm:$0xff]  ;;  %v1583_v6 = vld [vmem:[#allocation2 + $0x40] sm:$0xff]  ;;  %v1585_v7 = vld [vmem:[#allocation2 + $0x48] sm:$0xff] }
  0x1e   :  { %213 = vmatpush.msrb.mxu0 %v1510_v46  ;;  %233 = vmatpush.msrb.mxu1 %v1514_v47  ;;  %2322 = vst [vmem:[#allocation13_spill] sm:$0xff] %v1553_v59  ;;  %v1589_v8 = vld [vmem:[#allocation2 + $0x50] sm:$0xff]  ;;  %v1591_v9 = vld [vmem:[#allocation2 + $0x58] sm:$0xff] }
  0x1f   :  { %253 = vmatpush.msrb.mxu2 %v1516_v48  ;;  %273 = vmatpush.msrb.mxu3 %v1520_v49  ;;  %2323 = vst [vmem:[#allocation14_spill] sm:$0xff] %v1555_v60 }
  0x20   :  { %214 = vmatpush.msrb.mxu0 %v1527_v50  ;;  %234 = vmatpush.msrb.mxu1 %v1529_v51  ;;  %2324 = vst [vmem:[#allocation15_spill] sm:$0xff] %v1559_v61 }
  0x21   :  { %254 = vmatpush.msrb.mxu2 %v1531_v52  ;;  %274 = vmatpush.msrb.mxu3 %v1535_v53  ;;  %2325 = vst [vmem:[#allocation16_spill] sm:$0xff] %v1561_v62 }
  0x22   :  { %215 = vmatpush.msrb.mxu0 %v1539_v54  ;;  %235 = vmatpush.msrb.mxu1 %v1541_v55  ;;  %2326 = vst [vmem:[#allocation17_spill] sm:$0xff] %v1563_v63 }
  0x23   :  { %255 = vmatpush.msrb.mxu2 %v1543_v56  ;;  %275 = vmatpush.msrb.mxu3 %v1547_v57  ;;  %2327 = vst [vmem:[#allocation18_spill] sm:$0xff] %v1567_v0 }
  0x24   :  { %216 = vmatpush.msrb.mxu0 %v1551_v58  ;;  %236 = vmatpush.msrb.mxu1 %v1553_v59  ;;  %2328 = vst [vmem:[#allocation19_spill] sm:$0xff] %v1569_v1 }
  0x25   :  { %256 = vmatpush.msrb.mxu2 %v1555_v60  ;;  %276 = vmatpush.msrb.mxu3 %v1559_v61  ;;  %2329 = vst [vmem:[#allocation20_spill] sm:$0xff] %v1571_v2 }
  0x26   :  { %217 = vmatpush.msrb.mxu0 %v1561_v62  ;;  %237 = vmatpush.msrb.mxu1 %v1563_v63  ;;  %2330 = vst [vmem:[#allocation21_spill] sm:$0xff] %v1575_v3 }
  0x27   :  { %2331 = vst [vmem:[#allocation22_spill] sm:$0xff] %v1577_v4  ;;  %257 = vmatpush.msrb.mxu2 %v1567_v0  ;;  %277 = vmatpush.msrb.mxu3 %v1569_v1  ;;  %v103_v1 = vlaneseq }
  0x28   :  { %2332 = vst [vmem:[#allocation23_spill] sm:$0xff] %v1579_v5  ;;  %218 = vmatpush.msrb.mxu0 %v1571_v2  ;;  %238 = vmatpush.msrb.mxu1 %v1575_v3  ;;  %v1384_v3 = vmov 0.0  }
  0x29   :  { %2333 = vst [vmem:[#allocation24_spill] sm:$0xff] %v1583_v6  ;;  %258 = vmatpush.msrb.mxu2 %v1577_v4  ;;  %278 = vmatpush.msrb.mxu3 %v1579_v5  ;;  %v104_v2 = vand.u32 127, %v103_v1 }
  0x2a   :  { %2334 = vst [vmem:[#allocation25_spill] sm:$0xff] %v1585_v7  ;;  %219 = vmatpush.msrb.mxu0 %v1583_v6  ;;  %239 = vmatpush.msrb.mxu1 %v1585_v7 }
  0x2b   :  { %2335 = vst [vmem:[#allocation26_spill] sm:$0xff] %v1589_v8  ;;  %259 = vmatpush.msrb.mxu2 %v1589_v8  ;;  %279 = vmatpush.msrb.mxu3 %v1591_v9  ;;  %v2339_v1 = vld [vmem:[#allocation19_spill] sm:$0xff] }
  0x2c   :  { %2336 = vst [vmem:[#allocation27_spill] sm:$0xff] %v1591_v9 }
  0x7a   :  { %v107_v0 = vpop.permute.xlu0 %106 }
  0x7b   :  { %vm108_vm1 = vcmp.eq.s32.totalorder %v107_v0, %v104_v2  ;;  %v2338_v0 = vld [vmem:[#allocation18_spill] sm:$0xff]  ;;  %v2340_v2 = vld [vmem:[#allocation20_spill] sm:$0xff] }
  0x7c   :  { %v1170_v63 = vsel %vm108_vm1, 1.0, %v1384_v3 }
  0x7d   :  { %1171 = vmatmul.msk.f32.vlgmr.msra.gmra.mxu0 %vm120_vm0, %v1170_v63  ;;  %1172 = vmatmul.msk.f32.vlgmr.msra.gmra.mxu1 %vm120_vm0, %v1170_v63 }
  0x7e   :  { %1173 = vmatmul.msk.f32.vlgmr.msra.gmra.mxu2 %vm120_vm0, %v1170_v63  ;;  %1174 = vmatmul.msk.f32.vlgmr.msra.gmra.mxu3 %vm120_vm0, %v1170_v63  ;;  %v2337_v63 = vld [vmem:[#allocation17_spill] sm:$0xff] }
  0x7f   :  { %303 = vmatpush.msra.mxu0 %v1407_v10  ;;  %323 = vmatpush.msra.mxu1 %v1409_v11 }
  0x80   :  { %343 = vmatpush.msra.mxu2 %v1411_v12  ;;  %363 = vmatpush.msra.mxu3 %v1413_v13 }
  0x81   :  { %304 = vmatpush.msra.mxu0 %v1415_v14  ;;  %324 = vmatpush.msra.mxu1 %v1418_v15 }
  0x82   :  { %344 = vmatpush.msra.mxu2 %v1420_v16  ;;  %364 = vmatpush.msra.mxu3 %v1424_v17 }
  0x83   :  { %305 = vmatpush.msra.mxu0 %v1426_v18  ;;  %325 = vmatpush.msra.mxu1 %v1430_v19 }
  0x84   :  { %345 = vmatpush.msra.mxu2 %v1432_v20  ;;  %365 = vmatpush.msra.mxu3 %v1436_v21 }
  0x85   :  { %220 = vmatmul.f32.vlgmr.msrb.gmra.mxu0 %v1384_v3  ;;  %240 = vmatmul.f32.vlgmr.msrb.gmra.mxu1 %v1384_v3 }
  0x86   :  { %260 = vmatmul.f32.vlgmr.msrb.gmra.mxu2 %v1384_v3  ;;  %280 = vmatmul.f32.vlgmr.msrb.gmra.mxu3 %v1384_v3  ;;  %v2341_v3 = vld [vmem:[#allocation21_spill] sm:$0xff] }
  0x87   :  { %306 = vmatpush.msra.mxu0 %v1438_v22  ;;  %326 = vmatpush.msra.mxu1 %v1442_v23 }
  0x88   :  { %346 = vmatpush.msra.mxu2 %v1444_v24  ;;  %366 = vmatpush.msra.mxu3 %v1448_v25 }
  0x89   :  { %307 = vmatpush.msra.mxu0 %v1450_v26  ;;  %327 = vmatpush.msra.mxu1 %v1454_v27 }
  0x8a   :  { %347 = vmatpush.msra.mxu2 %v1456_v28  ;;  %367 = vmatpush.msra.mxu3 %v1460_v29 }
  0x8b   :  { %308 = vmatpush.msra.mxu0 %v1462_v30  ;;  %328 = vmatpush.msra.mxu1 %v1466_v31 }
  0x8c   :  { %348 = vmatpush.msra.mxu2 %v1468_v32  ;;  %368 = vmatpush.msra.mxu3 %v1472_v33 }
  0x8d   :  { %309 = vmatpush.msra.mxu0 %v1474_v34  ;;  %329 = vmatpush.msra.mxu1 %v1478_v35 }
  0x8e   :  { %349 = vmatpush.msra.mxu2 %v1480_v36  ;;  %369 = vmatpush.msra.mxu3 %v1484_v37 }
  0x8f   :  { %310 = vmatpush.msra.mxu0 %v1486_v38  ;;  %330 = vmatpush.msra.mxu1 %v1490_v39 }
  0x90   :  { %350 = vmatpush.msra.mxu2 %v1492_v40  ;;  %370 = vmatpush.msra.mxu3 %v1496_v41 }
  0x91   :  { %311 = vmatpush.msra.mxu0 %v1498_v42  ;;  %331 = vmatpush.msra.mxu1 %v1502_v43 }
  0x92   :  { %351 = vmatpush.msra.mxu2 %v1504_v44  ;;  %371 = vmatpush.msra.mxu3 %v1508_v45 }
  0x93   :  { %312 = vmatpush.msra.mxu0 %v1510_v46  ;;  %332 = vmatpush.msra.mxu1 %v1514_v47 }
  0x94   :  { %352 = vmatpush.msra.mxu2 %v1516_v48  ;;  %372 = vmatpush.msra.mxu3 %v1520_v49 }
  0x95   :  { %313 = vmatpush.msra.mxu0 %v1527_v50  ;;  %333 = vmatpush.msra.mxu1 %v1529_v51 }
  0x96   :  { %353 = vmatpush.msra.mxu2 %v1531_v52  ;;  %373 = vmatpush.msra.mxu3 %v1535_v53 }
  0x97   :  { %314 = vmatpush.msra.mxu0 %v1539_v54  ;;  %334 = vmatpush.msra.mxu1 %v1541_v55 }
  0x98   :  { %354 = vmatpush.msra.mxu2 %v1543_v56  ;;  %374 = vmatpush.msra.mxu3 %v1547_v57 }
  0x99   :  { %315 = vmatpush.msra.mxu0 %v1551_v58  ;;  %335 = vmatpush.msra.mxu1 %v1553_v59 }
  0x9a   :  { %355 = vmatpush.msra.mxu2 %v1555_v60  ;;  %375 = vmatpush.msra.mxu3 %v1559_v61 }
  0x9b   :  { %316 = vmatpush.msra.mxu0 %v1561_v62  ;;  %336 = vmatpush.msra.mxu1 %v2337_v63 }
  0x9c   :  { %356 = vmatpush.msra.mxu2 %v2338_v0  ;;  %376 = vmatpush.msra.mxu3 %v2339_v1 }
  0x9d   :  { %317 = vmatpush.msra.mxu0 %v2340_v2  ;;  %337 = vmatpush.msra.mxu1 %v2341_v3 }
  0x9e   :  { %357 = vmatpush.msra.mxu2 %v1577_v4  ;;  %377 = vmatpush.msra.mxu3 %v1579_v5 }
  0x9f   :  { %318 = vmatpush.msra.mxu0 %v1583_v6  ;;  %338 = vmatpush.msra.mxu1 %v1585_v7 }
  0xa0   :  { %358 = vmatpush.msra.mxu2 %v1589_v8  ;;  %378 = vmatpush.msra.mxu3 %v1591_v9 }
  0xa1   :  { %420 = vmatpush.msrb.mxu0 %v1407_v10  ;;  %440 = vmatpush.msrb.mxu1 %v1409_v11 }
  0xa2   :  { %460 = vmatpush.msrb.mxu2 %v1411_v12  ;;  %480 = vmatpush.msrb.mxu3 %v1413_v13 }
  0xa3   :  { %421 = vmatpush.msrb.mxu0 %v1415_v14  ;;  %441 = vmatpush.msrb.mxu1 %v1418_v15 }
  0xa4   :  { %461 = vmatpush.msrb.mxu2 %v1420_v16  ;;  %481 = vmatpush.msrb.mxu3 %v1424_v17 }
  0xa5   :  { %422 = vmatpush.msrb.mxu0 %v1426_v18  ;;  %442 = vmatpush.msrb.mxu1 %v1430_v19 }
  0xa6   :  { %462 = vmatpush.msrb.mxu2 %v1432_v20  ;;  %482 = vmatpush.msrb.mxu3 %v1436_v21 }
  0xa7   :  { %423 = vmatpush.msrb.mxu0 %v1438_v22  ;;  %443 = vmatpush.msrb.mxu1 %v1442_v23 }
  0xa8   :  { %463 = vmatpush.msrb.mxu2 %v1444_v24  ;;  %483 = vmatpush.msrb.mxu3 %v1448_v25 }
  0xa9   :  { %424 = vmatpush.msrb.mxu0 %v1450_v26  ;;  %444 = vmatpush.msrb.mxu1 %v1454_v27 }
  0xaa   :  { %464 = vmatpush.msrb.mxu2 %v1456_v28  ;;  %484 = vmatpush.msrb.mxu3 %v1460_v29 }
  0xab   :  { %425 = vmatpush.msrb.mxu0 %v1462_v30  ;;  %445 = vmatpush.msrb.mxu1 %v1466_v31 }
  0xac   :  { %465 = vmatpush.msrb.mxu2 %v1468_v32  ;;  %485 = vmatpush.msrb.mxu3 %v1472_v33 }
  0xad   :  { %426 = vmatpush.msrb.mxu0 %v1474_v34  ;;  %446 = vmatpush.msrb.mxu1 %v1478_v35 }
  0xae   :  { %466 = vmatpush.msrb.mxu2 %v1480_v36  ;;  %486 = vmatpush.msrb.mxu3 %v1484_v37 }
  0xaf   :  { %427 = vmatpush.msrb.mxu0 %v1486_v38  ;;  %447 = vmatpush.msrb.mxu1 %v1490_v39 }
  0xb0   :  { %467 = vmatpush.msrb.mxu2 %v1492_v40  ;;  %487 = vmatpush.msrb.mxu3 %v1496_v41 }
  0xb1   :  { %428 = vmatpush.msrb.mxu0 %v1498_v42  ;;  %448 = vmatpush.msrb.mxu1 %v1502_v43 }
  0xb2   :  { %468 = vmatpush.msrb.mxu2 %v1504_v44  ;;  %488 = vmatpush.msrb.mxu3 %v1508_v45 }
  0xb3   :  { %429 = vmatpush.msrb.mxu0 %v1510_v46  ;;  %449 = vmatpush.msrb.mxu1 %v1514_v47 }
  0xb4   :  { %469 = vmatpush.msrb.mxu2 %v1516_v48  ;;  %489 = vmatpush.msrb.mxu3 %v1520_v49 }
  0xb5   :  { %430 = vmatpush.msrb.mxu0 %v1527_v50  ;;  %450 = vmatpush.msrb.mxu1 %v1529_v51 }
  0xb6   :  { %470 = vmatpush.msrb.mxu2 %v1531_v52  ;;  %490 = vmatpush.msrb.mxu3 %v1535_v53 }
  0xb7   :  { %431 = vmatpush.msrb.mxu0 %v1539_v54  ;;  %451 = vmatpush.msrb.mxu1 %v1541_v55 }
  0xb8   :  { %471 = vmatpush.msrb.mxu2 %v1543_v56  ;;  %491 = vmatpush.msrb.mxu3 %v1547_v57 }
  0xb9   :  { %432 = vmatpush.msrb.mxu0 %v1551_v58  ;;  %452 = vmatpush.msrb.mxu1 %v1553_v59 }
  0xba   :  { %472 = vmatpush.msrb.mxu2 %v1555_v60  ;;  %492 = vmatpush.msrb.mxu3 %v1559_v61 }
  0xbb   :  { %433 = vmatpush.msrb.mxu0 %v1561_v62  ;;  %453 = vmatpush.msrb.mxu1 %v2337_v63  ;;  %v101_v63 = vld [vmem:[#allocation2 + $0x240] ss:$8 sm:$0xf] }
  0xbc   :  { %473 = vmatpush.msrb.mxu2 %v2338_v0  ;;  %493 = vmatpush.msrb.mxu3 %v2339_v1  ;;  %v112_v1 = vperm.slane %v101_v63, 0  ;;  %v113_v61 = vperm.slane %v101_v63, 1  ;;  %v115_v58 = vperm.slane %v101_v63, 3 }
  0xbd   :  { %434 = vmatpush.msrb.mxu0 %v2340_v2  ;;  %454 = vmatpush.msrb.mxu1 %v2341_v3 }
  0xbe   :  { %474 = vmatpush.msrb.mxu2 %v1577_v4  ;;  %494 = vmatpush.msrb.mxu3 %v1579_v5 }
  0xbf   :  { %435 = vmatpush.msrb.mxu0 %v1583_v6  ;;  %455 = vmatpush.msrb.mxu1 %v1585_v7 }
  0xc0   :  { %475 = vmatpush.msrb.mxu2 %v1589_v8  ;;  %495 = vmatpush.msrb.mxu3 %v1591_v9  ;;  %v114_v8 = vperm.slane %v101_v63, 2 }
  0xfa   :  { %v141_v0 = vpop.f32.mrf.mxu0  ;;  %v161_v62 = vpop.f32.mrf.mxu1 }
  0xfb   :  { %v1727_v2 = vadd.f32 %v141_v0, %v112_v1  ;;  %v1729_v3 = vadd.f32 %v161_v62, %v113_v61 }
  0xfd   :  { %2342 = vst [vmem:[#allocation28_spill] sm:$0xff] %v1727_v2 }
  0xfe   :  { %2343 = vst [vmem:[#allocation29_spill] sm:$0xff] %v1729_v3 }
 0x101   :  { %v181_v4 = vpop.f32.mrf.mxu2  ;;  %v201_v60 = vpop.f32.mrf.mxu3 }
 0x102   :  { %v221_v5 = vpop.f32.mrf.mxu0  ;;  %v241_v59 = vpop.f32.mrf.mxu1  ;;  %v1733_v9 = vadd.f32 %v181_v4, %v114_v8  ;;  %v1735_v57 = vadd.f32 %v201_v60, %v115_v58 }
 0x103   :  { %v284_v6 = vadd.f32 %v221_v5, %v1727_v2  ;;  %v285_v7 = vadd.f32 %v241_v59, %v1729_v3 }
 0x104   :  { %2344 = vst [vmem:[#allocation30_spill] sm:$0xff] %v1733_v9 }
 0x105   :  { %1184 = vtanh.f32 %v284_v6  ;;  %2345 = vst [vmem:[#allocation31_spill] sm:$0xff] %v1735_v57 }
 0x106   :  { %1186 = vtanh.f32 %v285_v7 }
 0x109   :  { %v261_v0 = vpop.f32.mrf.mxu2  ;;  %v281_v1 = vpop.f32.mrf.mxu3 }
 0x10a   :  { %v286_v61 = vadd.f32 %v261_v0, %v1733_v9  ;;  %v287_v56 = vadd.f32 %v281_v1, %v1735_v57  ;;  %v2351_v1 = vld [vmem:[#allocation14_spill] sm:$0xff] }
 0x10b   :  { %v1185_v62 = vpop.eup %1184 }
 0x10c   :  { %v1187_v55 = vpop.eup %1186  ;;  %1188 = vtanh.f32 %v286_v61  ;;  %v292_v5 = vmul.f32 0.5, %v1185_v62  ;;  %v2352_v61 = vld [vmem:[#allocation15_spill] sm:$0xff]  ;;  %v2353_v62 = vld [vmem:[#allocation16_spill] sm:$0xff] }
 0x10d   :  { %v294_v2 = vmul.f32 0.5, %v1187_v55  ;;  %1190 = vtanh.f32 %v287_v56  ;;  %v2346_v55 = vld [vmem:[#allocation9_spill] sm:$0xff]  ;;  %v2347_v56 = vld [vmem:[#allocation10_spill] sm:$0xff] }
 0x10e   :  { %v293_v63 = vadd.f32 0.5, %v292_v5  ;;  %v2354_v5 = vld [vmem:[#allocation17_spill] sm:$0xff] }
 0x10f   :  { %v295_v59 = vadd.f32 0.5, %v294_v2  ;;  %v2349_v2 = vld [vmem:[#allocation12_spill] sm:$0xff] }
 0x111   :  { %v298_v7 = vmul.f32 0.0, %v295_v59  ;;  %v2355_v59 = vld [vmem:[#allocation18_spill] sm:$0xff] }
 0x112   :  { %v1189_v6 = vpop.eup %1188 }
 0x113   :  { %v299_v4 = vmul.f32 %v1189_v6, %v293_v63  ;;  %v1191_v8 = vpop.eup %1190  ;;  %v2356_v63 = vld [vmem:[#allocation19_spill] sm:$0xff]  ;;  %v2357_v6 = vld [vmem:[#allocation20_spill] sm:$0xff] }
 0x114   :  { %v296_v60 = vmul.f32 0.5, %v1191_v8  ;;  %v2360_v8 = vld [vmem:[#allocation23_spill] sm:$0xff] }
 0x115   :  { %v1739_v58 = vadd.f32 %v299_v4, %v298_v7  ;;  %v2358_v7 = vld [vmem:[#allocation21_spill] sm:$0xff]  ;;  %v2359_v4 = vld [vmem:[#allocation22_spill] sm:$0xff] }
 0x116   :  { %v297_v0 = vadd.f32 0.5, %v296_v60  ;;  %v2361_v60 = vld [vmem:[#allocation24_spill] sm:$0xff] }
 0x117   :  { %1192 = vtanh.f32 %v1739_v58 }
 0x11d   :  { %v1193_v9 = vpop.eup %1192 }
 0x11e   :  { %v302_v3 = vmul.f32 %v1193_v9, %v297_v0  ;;  %v2348_v9 = vld [vmem:[#allocation11_spill] sm:$0xff]  ;;  %v2362_v0 = vld [vmem:[#allocation25_spill] sm:$0xff] }
 0x120   :  { %319 = vmatmul.f32.vlgmr.msra.gmra.mxu0 %v302_v3  ;;  %339 = vmatmul.f32.vlgmr.msra.gmra.mxu1 %v302_v3 }
 0x121   :  { %359 = vmatmul.f32.vlgmr.msra.gmra.mxu2 %v302_v3  ;;  %379 = vmatmul.f32.vlgmr.msra.gmra.mxu3 %v302_v3  ;;  %v2350_v3 = vld [vmem:[#allocation13_spill] sm:$0xff] }
 0x122   :  { %537 = vmatpush.msra.mxu0 %v1407_v10  ;;  %557 = vmatpush.msra.mxu1 %v1409_v11 }
 0x123   :  { %577 = vmatpush.msra.mxu2 %v1411_v12  ;;  %597 = vmatpush.msra.mxu3 %v1413_v13 }
 0x124   :  { %538 = vmatpush.msra.mxu0 %v1415_v14  ;;  %558 = vmatpush.msra.mxu1 %v1418_v15 }
 0x125   :  { %578 = vmatpush.msra.mxu2 %v1420_v16  ;;  %598 = vmatpush.msra.mxu3 %v1424_v17 }
 0x126   :  { %539 = vmatpush.msra.mxu0 %v1426_v18  ;;  %559 = vmatpush.msra.mxu1 %v1430_v19 }
 0x127   :  { %579 = vmatpush.msra.mxu2 %v1432_v20  ;;  %599 = vmatpush.msra.mxu3 %v1436_v21 }
 0x128   :  { %540 = vmatpush.msra.mxu0 %v1438_v22  ;;  %560 = vmatpush.msra.mxu1 %v1442_v23 }
 0x129   :  { %580 = vmatpush.msra.mxu2 %v1444_v24  ;;  %600 = vmatpush.msra.mxu3 %v1448_v25 }
 0x12a   :  { %541 = vmatpush.msra.mxu0 %v1450_v26  ;;  %561 = vmatpush.msra.mxu1 %v1454_v27 }
 0x12b   :  { %581 = vmatpush.msra.mxu2 %v1456_v28  ;;  %601 = vmatpush.msra.mxu3 %v1460_v29 }
 0x12c   :  { %542 = vmatpush.msra.mxu0 %v1462_v30  ;;  %562 = vmatpush.msra.mxu1 %v1466_v31 }
 0x12d   :  { %582 = vmatpush.msra.mxu2 %v1468_v32  ;;  %602 = vmatpush.msra.mxu3 %v1472_v33 }
 0x12e   :  { %543 = vmatpush.msra.mxu0 %v1474_v34  ;;  %563 = vmatpush.msra.mxu1 %v1478_v35 }
 0x12f   :  { %583 = vmatpush.msra.mxu2 %v1480_v36  ;;  %603 = vmatpush.msra.mxu3 %v1484_v37 }
 0x130   :  { %544 = vmatpush.msra.mxu0 %v1486_v38  ;;  %564 = vmatpush.msra.mxu1 %v1490_v39 }
 0x131   :  { %584 = vmatpush.msra.mxu2 %v1492_v40  ;;  %604 = vmatpush.msra.mxu3 %v1496_v41 }
 0x132   :  { %545 = vmatpush.msra.mxu0 %v1498_v42  ;;  %565 = vmatpush.msra.mxu1 %v1502_v43 }
 0x133   :  { %585 = vmatpush.msra.mxu2 %v1504_v44  ;;  %605 = vmatpush.msra.mxu3 %v1508_v45 }
 0x134   :  { %546 = vmatpush.msra.mxu0 %v1510_v46  ;;  %566 = vmatpush.msra.mxu1 %v1514_v47 }
 0x135   :  { %586 = vmatpush.msra.mxu2 %v1516_v48  ;;  %606 = vmatpush.msra.mxu3 %v1520_v49 }
 0x136   :  { %547 = vmatpush.msra.mxu0 %v1527_v50  ;;  %567 = vmatpush.msra.mxu1 %v1529_v51 }
 0x137   :  { %587 = vmatpush.msra.mxu2 %v1531_v52  ;;  %607 = vmatpush.msra.mxu3 %v1535_v53 }
 0x138   :  { %548 = vmatpush.msra.mxu0 %v1539_v54  ;;  %568 = vmatpush.msra.mxu1 %v2346_v55 }
 0x139   :  { %588 = vmatpush.msra.mxu2 %v2347_v56  ;;  %608 = vmatpush.msra.mxu3 %v2348_v9  ;;  %v2367_v56 = vld [vmem:[#allocation30_spill] sm:$0xff] }
 0x13a   :  { %549 = vmatpush.msra.mxu0 %v2349_v2  ;;  %569 = vmatpush.msra.mxu1 %v2350_v3  ;;  %v2365_v3 = vld [vmem:[#allocation28_spill] sm:$0xff]  ;;  %v2366_v2 = vld [vmem:[#allocation29_spill] sm:$0xff] }
 0x13b   :  { %589 = vmatpush.msra.mxu2 %v2351_v1  ;;  %609 = vmatpush.msra.mxu3 %v2352_v61  ;;  %v2363_v61 = vld [vmem:[#allocation26_spill] sm:$0xff] }
 0x13c   :  { %550 = vmatpush.msra.mxu0 %v2353_v62  ;;  %570 = vmatpush.msra.mxu1 %v2354_v5  ;;  %v2364_v62 = vld [vmem:[#allocation27_spill] sm:$0xff] }
 0x13d   :  { %590 = vmatpush.msra.mxu2 %v2355_v59  ;;  %610 = vmatpush.msra.mxu3 %v2356_v63 }
 0x13e   :  { %551 = vmatpush.msra.mxu0 %v2357_v6  ;;  %571 = vmatpush.msra.mxu1 %v2358_v7 }
 0x13f   :  { %591 = vmatpush.msra.mxu2 %v2359_v4  ;;  %611 = vmatpush.msra.mxu3 %v2360_v8 }
 0x140   :  { %552 = vmatpush.msra.mxu0 %v2361_v60  ;;  %572 = vmatpush.msra.mxu1 %v2362_v0 }
 0x141   :  { %592 = vmatpush.msra.mxu2 %v2363_v61  ;;  %612 = vmatpush.msra.mxu3 %v2364_v62 }
 0x19d   :  { %v320_v5 = vpop.f32.mrf.mxu0  ;;  %v340_v59 = vpop.f32.mrf.mxu1 }
 0x19e   :  { %v387_v1 = vrot.slane %v320_v5, 7  ;;  %v388_v63 = vrot.slane %v340_v59, 7 }
 0x1a0   :  { %v395_v6 = vadd.f32 %v387_v1, %v2365_v3  ;;  %v396_v7 = vadd.f32 %v388_v63, %v2366_v2  ;;  %v410_v63 = vrot.slane %v1739_v58, 7  ;;  %v2383_v58 = vld [vmem:[#allocation23_spill] sm:$0xff] }
 0x1a2   :  { %1194 = vtanh.f32 %v395_v6 }
 0x1a3   :  { %1196 = vtanh.f32 %v396_v7 }
 0x1a4   :  { %v360_v4 = vpop.f32.mrf.mxu2  ;;  %v380_v8 = vpop.f32.mrf.mxu3 }
 0x1a5   :  { %v389_v9 = vrot.slane %v360_v4, 7  ;;  %v390_v60 = vrot.slane %v380_v8, 7 }
 0x1a7   :  { %v397_v0 = vadd.f32 %v389_v9, %v2367_v56  ;;  %v398_v61 = vadd.f32 %v390_v60, %v1735_v57 }
 0x1a8   :  { %v1195_v55 = vpop.eup %1194 }
 0x1a9   :  { %v1197_v62 = vpop.eup %1196  ;;  %1198 = vtanh.f32 %v397_v0  ;;  %v403_v54 = vmul.f32 0.5, %v1195_v55  ;;  %v2384_v55 = vld [vmem:[#allocation24_spill] sm:$0xff] }
 0x1aa   :  { %v405_v5 = vmul.f32 0.5, %v1197_v62  ;;  %1200 = vtanh.f32 %v398_v61  ;;  %v2387_v61 = vld [vmem:[#allocation27_spill] sm:$0xff] }
 0x1ab   :  { %v404_v1 = vadd.f32 0.5, %v403_v54  ;;  %v2381_v54 = vld [vmem:[#allocation21_spill] sm:$0xff] }
 0x1ac   :  { %v406_v59 = vadd.f32 0.5, %v405_v5 }
 0x1ae   :  { %v412_v7 = vmul.f32 %v410_v63, %v406_v59  ;;  %v2388_v63 = vld [vmem:[#allocation28_spill] sm:$0xff] }
 0x1af   :  { %v1199_v6 = vpop.eup %1198 }
 0x1b0   :  { %v413_v2 = vmul.f32 %v1199_v6, %v404_v1  ;;  %v1201_v3 = vpop.eup %1200 }
 0x1b1   :  { %v407_v9 = vmul.f32 0.5, %v1201_v3  ;;  %v2386_v3 = vld [vmem:[#allocation26_spill] sm:$0xff] }
 0x1b2   :  { %v1811_v4 = vadd.f32 %v413_v2, %v412_v7  ;;  %v2385_v2 = vld [vmem:[#allocation25_spill] sm:$0xff] }
 0x1b3   :  { %v408_v8 = vadd.f32 0.5, %v407_v9  ;;  %v2389_v7 = vld [vmem:[#allocation29_spill] sm:$0xff] }
 0x1b4   :  { %1202 = vtanh.f32 %v1811_v4 }
 0x1ba   :  { %v1203_v60 = vpop.eup %1202 }
 0x1bb   :  { %v416_v57 = vmul.f32 %v1203_v60, %v408_v8 }
 0x1bd   :  { %v418_v0 = vrot.slane %v416_v57, 1  ;;  %v2382_v57 = vld [vmem:[#allocation22_spill] sm:$0xff] }
 0x1bf   :  { %436 = vmatmul.f32.vlgmr.msrb.gmra.mxu0 %v418_v0  ;;  %456 = vmatmul.f32.vlgmr.msrb.gmra.mxu1 %v418_v0 }
 0x1c0   :  { %476 = vmatmul.f32.vlgmr.msrb.gmra.mxu2 %v418_v0  ;;  %496 = vmatmul.f32.vlgmr.msrb.gmra.mxu3 %v418_v0 }
 0x1c1   :  { %654 = vmatpush.msrb.mxu0 %v1407_v10  ;;  %674 = vmatpush.msrb.mxu1 %v1409_v11  ;;  %v2368_v10 = vld [vmem:[#allocation8_spill] sm:$0xff]  ;;  %v2369_v11 = vld [vmem:[#allocation9_spill] sm:$0xff] }
 0x1c2   :  { %694 = vmatpush.msrb.mxu2 %v1411_v12  ;;  %714 = vmatpush.msrb.mxu3 %v1413_v13  ;;  %v2370_v12 = vld [vmem:[#allocation10_spill] sm:$0xff]  ;;  %v2371_v13 = vld [vmem:[#allocation11_spill] sm:$0xff] }
 0x1c3   :  { %655 = vmatpush.msrb.mxu0 %v1415_v14  ;;  %675 = vmatpush.msrb.mxu1 %v1418_v15  ;;  %v2372_v14 = vld [vmem:[#allocation12_spill] sm:$0xff]  ;;  %v2373_v15 = vld [vmem:[#allocation13_spill] sm:$0xff] }
 0x1c4   :  { %695 = vmatpush.msrb.mxu2 %v1420_v16  ;;  %715 = vmatpush.msrb.mxu3 %v1424_v17  ;;  %v2374_v16 = vld [vmem:[#allocation14_spill] sm:$0xff]  ;;  %v2375_v17 = vld [vmem:[#allocation15_spill] sm:$0xff] }
 0x1c5   :  { %656 = vmatpush.msrb.mxu0 %v1426_v18  ;;  %676 = vmatpush.msrb.mxu1 %v1430_v19  ;;  %v2376_v18 = vld [vmem:[#allocation16_spill] sm:$0xff]  ;;  %v2377_v19 = vld [vmem:[#allocation17_spill] sm:$0xff] }
 0x1c6   :  { %696 = vmatpush.msrb.mxu2 %v1432_v20  ;;  %716 = vmatpush.msrb.mxu3 %v1436_v21  ;;  %v2378_v20 = vld [vmem:[#allocation18_spill] sm:$0xff]  ;;  %v2379_v21 = vld [vmem:[#allocation19_spill] sm:$0xff] }
 0x1c7   :  { %657 = vmatpush.msrb.mxu0 %v1438_v22  ;;  %677 = vmatpush.msrb.mxu1 %v1442_v23  ;;  %v2380_v22 = vld [vmem:[#allocation20_spill] sm:$0xff] }
 0x1c8   :  { %697 = vmatpush.msrb.mxu2 %v1444_v24  ;;  %717 = vmatpush.msrb.mxu3 %v1448_v25 }
 0x1c9   :  { %658 = vmatpush.msrb.mxu0 %v1450_v26  ;;  %678 = vmatpush.msrb.mxu1 %v1454_v27 }
 0x1ca   :  { %698 = vmatpush.msrb.mxu2 %v1456_v28  ;;  %718 = vmatpush.msrb.mxu3 %v1460_v29 }
 0x1cb   :  { %659 = vmatpush.msrb.mxu0 %v1462_v30  ;;  %679 = vmatpush.msrb.mxu1 %v1466_v31 }
 0x1cc   :  { %699 = vmatpush.msrb.mxu2 %v1468_v32  ;;  %719 = vmatpush.msrb.mxu3 %v1472_v33 }
 0x1cd   :  { %660 = vmatpush.msrb.mxu0 %v1474_v34  ;;  %680 = vmatpush.msrb.mxu1 %v1478_v35 }
 0x1ce   :  { %700 = vmatpush.msrb.mxu2 %v1480_v36  ;;  %720 = vmatpush.msrb.mxu3 %v1484_v37 }
 0x1cf   :  { %661 = vmatpush.msrb.mxu0 %v1486_v38  ;;  %681 = vmatpush.msrb.mxu1 %v1490_v39 }
 0x1d0   :  { %701 = vmatpush.msrb.mxu2 %v1492_v40  ;;  %721 = vmatpush.msrb.mxu3 %v1496_v41 }
 0x1d1   :  { %662 = vmatpush.msrb.mxu0 %v1498_v42  ;;  %682 = vmatpush.msrb.mxu1 %v1502_v43 }
 0x1d2   :  { %702 = vmatpush.msrb.mxu2 %v1504_v44  ;;  %722 = vmatpush.msrb.mxu3 %v1508_v45 }
 0x1d3   :  { %663 = vmatpush.msrb.mxu0 %v1510_v46  ;;  %683 = vmatpush.msrb.mxu1 %v1514_v47 }
 0x1d4   :  { %703 = vmatpush.msrb.mxu2 %v1516_v48  ;;  %723 = vmatpush.msrb.mxu3 %v1520_v49 }
 0x1d5   :  { %664 = vmatpush.msrb.mxu0 %v1527_v50  ;;  %684 = vmatpush.msrb.mxu1 %v1529_v51 }
 0x1d6   :  { %704 = vmatpush.msrb.mxu2 %v1531_v52  ;;  %724 = vmatpush.msrb.mxu3 %v1535_v53 }
 0x1d7   :  { %665 = vmatpush.msrb.mxu0 %v2368_v10  ;;  %685 = vmatpush.msrb.mxu1 %v2369_v11 }
 0x1d8   :  { %705 = vmatpush.msrb.mxu2 %v2370_v12  ;;  %725 = vmatpush.msrb.mxu3 %v2371_v13 }
 0x1d9   :  { %666 = vmatpush.msrb.mxu0 %v2372_v14  ;;  %686 = vmatpush.msrb.mxu1 %v2373_v15 }
 0x1da   :  { %706 = vmatpush.msrb.mxu2 %v2374_v16  ;;  %726 = vmatpush.msrb.mxu3 %v2375_v17 }
 0x1db   :  { %667 = vmatpush.msrb.mxu0 %v2376_v18  ;;  %687 = vmatpush.msrb.mxu1 %v2377_v19 }
 0x1dc   :  { %707 = vmatpush.msrb.mxu2 %v2378_v20  ;;  %727 = vmatpush.msrb.mxu3 %v2379_v21 }
 0x1dd   :  { %668 = vmatpush.msrb.mxu0 %v2380_v22  ;;  %688 = vmatpush.msrb.mxu1 %v2381_v54 }
 0x1de   :  { %708 = vmatpush.msrb.mxu2 %v2382_v57  ;;  %728 = vmatpush.msrb.mxu3 %v2383_v58 }
 0x1df   :  { %669 = vmatpush.msrb.mxu0 %v2384_v55  ;;  %689 = vmatpush.msrb.mxu1 %v2385_v2 }
 0x1e0   :  { %709 = vmatpush.msrb.mxu2 %v2386_v3  ;;  %729 = vmatpush.msrb.mxu3 %v2387_v61  ;;  %v2390_v3 = vld [vmem:[#allocation31_spill] sm:$0xff] }
 0x23c   :  { %v437_v62 = vpop.f32.mrf.mxu0  ;;  %v457_v5 = vpop.f32.mrf.mxu1 }
 0x23d   :  { %v504_v59 = vrot.slane %v437_v62, 6  ;;  %v505_v1 = vrot.slane %v457_v5, 6 }
 0x23f   :  { %v512_v6 = vadd.f32 %v504_v59, %v2388_v63  ;;  %v513_v9 = vadd.f32 %v505_v1, %v2389_v7  ;;  %v527_v1 = vrot.slane %v1811_v4, 7  ;;  %v1889_v4 = vld [vmem:[#allocation2 + $0x228] sm:$0xff] }
 0x241   :  { %1204 = vtanh.f32 %v512_v6 }
 0x242   :  { %1206 = vtanh.f32 %v513_v9 }
 0x243   :  { %v477_v8 = vpop.f32.mrf.mxu2  ;;  %v497_v60 = vpop.f32.mrf.mxu3 }
 0x244   :  { %v506_v0 = vrot.slane %v477_v8, 6  ;;  %v507_v55 = vrot.slane %v497_v60, 6 }
 0x246   :  { %v514_v2 = vadd.f32 %v506_v0, %v2367_v56  ;;  %v515_v57 = vadd.f32 %v507_v55, %v2390_v3 }
 0x247   :  { %v1205_v58 = vpop.eup %1204 }
 0x248   :  { %v1207_v61 = vpop.eup %1206  ;;  %1208 = vtanh.f32 %v514_v2  ;;  %v520_v54 = vmul.f32 0.5, %v1205_v58  ;;  %v1895_v58 = vld [vmem:[#allocation2 + $0x238] sm:$0xff] }
 0x249   :  { %v522_v62 = vmul.f32 0.5, %v1207_v61  ;;  %1210 = vtanh.f32 %v515_v57  ;;  %v1892_v57 = vld [vmem:[#allocation2 + $0x230] sm:$0xff]  ;;  %v1901_v61 = vld [vmem:[#allocation2 + $0x208] sm:$0xff] }
 0x24a   :  { %v521_v59 = vadd.f32 0.5, %v520_v54  ;;  %v1886_v54 = vld [vmem:[#allocation2 + $0x220] sm:$0xff] }
 0x24b   :  { %v523_v5 = vadd.f32 0.5, %v522_v62  ;;  %v1910_v62 = vld [vmem:[#allocation2 + $0x1e0] sm:$0xff] }
 0x24d   :  { %v529_v9 = vmul.f32 %v527_v1, %v523_v5  ;;  %v1913_v5 = vld [vmem:[#allocation2 + $0x1e8] sm:$0xff]  ;;  %v1919_v1 = vld [vmem:[#allocation2 + $0x1f8] sm:$0xff] }
 0x24e   :  { %v1209_v6 = vpop.eup %1208 }
 0x24f   :  { %v530_v7 = vmul.f32 %v1209_v6, %v521_v59  ;;  %v1211_v63 = vpop.eup %1210  ;;  %v1916_v59 = vld [vmem:[#allocation2 + $0x1f0] sm:$0xff]  ;;  %v1922_v6 = vld [vmem:[#allocation2 + $0x1c0] sm:$0xff] }
 0x250   :  { %v524_v60 = vmul.f32 0.5, %v1211_v63  ;;  %v1904_v63 = vld [vmem:[#allocation2 + $0x210] sm:$0xff] }
 0x251   :  { %v1883_v8 = vadd.f32 %v530_v7, %v529_v9  ;;  %v1907_v7 = vld [vmem:[#allocation2 + $0x218] sm:$0xff]  ;;  %v2012_v9 = vld [vmem:[#allocation2 + $0x1b0] sm:$0xff] }
 0x252   :  { %v525_v0 = vadd.f32 0.5, %v524_v60  ;;  %v2018_v60 = vld [vmem:[#allocation2 + $0x180] sm:$0xff] }
 0x253   :  { %1212 = vtanh.f32 %v1883_v8 }
 0x259   :  { %v1213_v55 = vpop.eup %1212 }
 0x25a   :  { %v533_v3 = vmul.f32 %v1213_v55, %v525_v0  ;;  %v2021_v0 = vld [vmem:[#allocation2 + $0x188] sm:$0xff]  ;;  %v2024_v55 = vld [vmem:[#allocation2 + $0x190] sm:$0xff] }
 0x25c   :  { %v535_v2 = vrot.slane %v533_v3, 2  ;;  %v1898_v3 = vld [vmem:[#allocation2 + $0x200] sm:$0xff] }
 0x25e   :  { %553 = vmatmul.f32.vlgmr.msra.gmra.mxu0 %v535_v2  ;;  %573 = vmatmul.f32.vlgmr.msra.gmra.mxu1 %v535_v2 }
 0x25f   :  { %593 = vmatmul.f32.vlgmr.msra.gmra.mxu2 %v535_v2  ;;  %613 = vmatmul.f32.vlgmr.msra.gmra.mxu3 %v535_v2  ;;  %v2027_v2 = vld [vmem:[#allocation2 + $0x198] sm:$0xff] }
 0x260   :  { %771 = vmatpush.msra.mxu0 %v1886_v54  ;;  %791 = vmatpush.msra.mxu1 %v1889_v4 }
 0x261   :  { %811 = vmatpush.msra.mxu2 %v1892_v57  ;;  %831 = vmatpush.msra.mxu3 %v1895_v58 }
 0x262   :  { %772 = vmatpush.msra.mxu0 %v1898_v3  ;;  %792 = vmatpush.msra.mxu1 %v1901_v61 }
 0x263   :  { %812 = vmatpush.msra.mxu2 %v1904_v63  ;;  %832 = vmatpush.msra.mxu3 %v1907_v7 }
 0x264   :  { %773 = vmatpush.msra.mxu0 %v1910_v62  ;;  %793 = vmatpush.msra.mxu1 %v1913_v5 }
 0x265   :  { %813 = vmatpush.msra.mxu2 %v1916_v59  ;;  %833 = vmatpush.msra.mxu3 %v1919_v1 }
 0x266   :  { %774 = vmatpush.msra.mxu0 %v1922_v6  ;;  %794 = vmatpush.msra.mxu1 %v1442_v23  ;;  %v2391_v23 = vld [vmem:[#allocation21_spill] sm:$0xff] }
 0x267   :  { %814 = vmatpush.msra.mxu2 %v1444_v24  ;;  %834 = vmatpush.msra.mxu3 %v1448_v25  ;;  %v2392_v24 = vld [vmem:[#allocation22_spill] sm:$0xff]  ;;  %v2393_v25 = vld [vmem:[#allocation23_spill] sm:$0xff] }
 0x268   :  { %775 = vmatpush.msra.mxu0 %v1450_v26  ;;  %795 = vmatpush.msra.mxu1 %v1454_v27  ;;  %v2394_v26 = vld [vmem:[#allocation24_spill] sm:$0xff]  ;;  %v2395_v27 = vld [vmem:[#allocation25_spill] sm:$0xff] }
 0x269   :  { %815 = vmatpush.msra.mxu2 %v1456_v28  ;;  %835 = vmatpush.msra.mxu3 %v1460_v29  ;;  %v2396_v28 = vld [vmem:[#allocation26_spill] sm:$0xff]  ;;  %v2397_v29 = vld [vmem:[#allocation27_spill] sm:$0xff] }
 0x26a   :  { %776 = vmatpush.msra.mxu0 %v1462_v30  ;;  %796 = vmatpush.msra.mxu1 %v1466_v31 }
 0x26b   :  { %816 = vmatpush.msra.mxu2 %v1468_v32  ;;  %836 = vmatpush.msra.mxu3 %v1472_v33 }
 0x26c   :  { %777 = vmatpush.msra.mxu0 %v1474_v34  ;;  %797 = vmatpush.msra.mxu1 %v1478_v35  ;;  %v2398_v34 = vld [vmem:[#allocation28_spill] sm:$0xff] }
 0x26d   :  { %817 = vmatpush.msra.mxu2 %v1480_v36  ;;  %837 = vmatpush.msra.mxu3 %v1484_v37  ;;  %v2399_v36 = vld [vmem:[#allocation29_spill] sm:$0xff] }
 0x26e   :  { %778 = vmatpush.msra.mxu0 %v1486_v38  ;;  %798 = vmatpush.msra.mxu1 %v1490_v39 }
 0x26f   :  { %818 = vmatpush.msra.mxu2 %v1492_v40  ;;  %838 = vmatpush.msra.mxu3 %v1496_v41 }
 0x270   :  { %779 = vmatpush.msra.mxu0 %v1498_v42  ;;  %799 = vmatpush.msra.mxu1 %v1502_v43 }
 0x271   :  { %819 = vmatpush.msra.mxu2 %v1504_v44  ;;  %839 = vmatpush.msra.mxu3 %v1508_v45  ;;  %v2400_v44 = vld [vmem:[#allocation31_spill] sm:$0xff] }
 0x272   :  { %780 = vmatpush.msra.mxu0 %v1510_v46  ;;  %800 = vmatpush.msra.mxu1 %v1514_v47 }
 0x273   :  { %820 = vmatpush.msra.mxu2 %v1516_v48  ;;  %840 = vmatpush.msra.mxu3 %v1520_v49 }
 0x274   :  { %781 = vmatpush.msra.mxu0 %v1527_v50  ;;  %801 = vmatpush.msra.mxu1 %v1529_v51  ;;  %v644_v51 = vrot.slane %v1883_v8, 7  ;;  %v2015_v8 = vld [vmem:[#allocation2 + $0x1b8] sm:$0xff] }
 0x275   :  { %821 = vmatpush.msra.mxu2 %v1531_v52  ;;  %841 = vmatpush.msra.mxu3 %v1535_v53 }
 0x276   :  { %782 = vmatpush.msra.mxu0 %v2368_v10  ;;  %802 = vmatpush.msra.mxu1 %v2369_v11 }
 0x277   :  { %822 = vmatpush.msra.mxu2 %v2370_v12  ;;  %842 = vmatpush.msra.mxu3 %v2371_v13 }
 0x278   :  { %783 = vmatpush.msra.mxu0 %v2372_v14  ;;  %803 = vmatpush.msra.mxu1 %v2373_v15 }
 0x279   :  { %823 = vmatpush.msra.mxu2 %v2374_v16  ;;  %843 = vmatpush.msra.mxu3 %v2375_v17 }
 0x27a   :  { %784 = vmatpush.msra.mxu0 %v2376_v18  ;;  %804 = vmatpush.msra.mxu1 %v2377_v19  ;;  %v1997_v18 = vld [vmem:[#allocation2 + $0x1c8] sm:$0xff]  ;;  %v2000_v19 = vld [vmem:[#allocation2 + $0x1d0] sm:$0xff] }
 0x27b   :  { %824 = vmatpush.msra.mxu2 %v2378_v20  ;;  %844 = vmatpush.msra.mxu3 %v2379_v21  ;;  %v2003_v20 = vld [vmem:[#allocation2 + $0x1d8] sm:$0xff]  ;;  %v2006_v21 = vld [vmem:[#allocation2 + $0x1a0] sm:$0xff] }
 0x27c   :  { %785 = vmatpush.msra.mxu0 %v2380_v22  ;;  %805 = vmatpush.msra.mxu1 %v2391_v23  ;;  %v2009_v22 = vld [vmem:[#allocation2 + $0x1a8] sm:$0xff]  ;;  %v2030_v23 = vld [vmem:[#allocation2 + $0x160] sm:$0xff] }
 0x27d   :  { %825 = vmatpush.msra.mxu2 %v2392_v24  ;;  %845 = vmatpush.msra.mxu3 %v2393_v25  ;;  %v2033_v24 = vld [vmem:[#allocation2 + $0x168] sm:$0xff]  ;;  %v2036_v25 = vld [vmem:[#allocation2 + $0x170] sm:$0xff] }
 0x27e   :  { %786 = vmatpush.msra.mxu0 %v2394_v26  ;;  %806 = vmatpush.msra.mxu1 %v2395_v27  ;;  %v2039_v26 = vld [vmem:[#allocation2 + $0x178] sm:$0xff]  ;;  %v2042_v27 = vld [vmem:[#allocation2 + $0x140] sm:$0xff] }
 0x27f   :  { %826 = vmatpush.msra.mxu2 %v2396_v28  ;;  %846 = vmatpush.msra.mxu3 %v2397_v29  ;;  %v2045_v28 = vld [vmem:[#allocation2 + $0x148] sm:$0xff]  ;;  %v2048_v29 = vld [vmem:[#allocation2 + $0x150] sm:$0xff] }
 0x2db   :  { %v554_v30 = vpop.f32.mrf.mxu0  ;;  %v574_v31 = vpop.f32.mrf.mxu1 }
 0x2dc   :  { %v621_v32 = vrot.slane %v554_v30, 5  ;;  %v622_v33 = vrot.slane %v574_v31, 5  ;;  %v2051_v30 = vld [vmem:[#allocation2 + $0x158] sm:$0xff]  ;;  %v2054_v31 = vld [vmem:[#allocation2 + $0x120] sm:$0xff] }
 0x2de   :  { %v629_v35 = vadd.f32 %v621_v32, %v2398_v34  ;;  %v630_v37 = vadd.f32 %v622_v33, %v2399_v36  ;;  %v2057_v32 = vld [vmem:[#allocation2 + $0x128] sm:$0xff]  ;;  %v2060_v33 = vld [vmem:[#allocation2 + $0x130] sm:$0xff] }
 0x2e0   :  { %1214 = vtanh.f32 %v629_v35  ;;  %v2063_v35 = vld [vmem:[#allocation2 + $0x138] sm:$0xff] }
 0x2e1   :  { %1216 = vtanh.f32 %v630_v37  ;;  %v2066_v37 = vld [vmem:[#allocation2 + $0x100] sm:$0xff] }
 0x2e2   :  { %v594_v38 = vpop.f32.mrf.mxu2  ;;  %v614_v39 = vpop.f32.mrf.mxu3 }
 0x2e3   :  { %v623_v40 = vrot.slane %v594_v38, 5  ;;  %v624_v41 = vrot.slane %v614_v39, 5  ;;  %v2069_v38 = vld [vmem:[#allocation2 + $0x108] sm:$0xff]  ;;  %v2072_v39 = vld [vmem:[#allocation2 + $0x110] sm:$0xff] }
 0x2e5   :  { %v631_v42 = vadd.f32 %v623_v40, %v2367_v56  ;;  %v632_v45 = vadd.f32 %v624_v41, %v2400_v44  ;;  %v2075_v40 = vld [vmem:[#allocation2 + $0x118] sm:$0xff]  ;;  %v2078_v41 = vld [vmem:[#allocation2 + $0xe0] sm:$0xff] }
 0x2e6   :  { %v1215_v43 = vpop.eup %1214 }
 0x2e7   :  { %v1217_v46 = vpop.eup %1216  ;;  %1218 = vtanh.f32 %v631_v42  ;;  %v637_v47 = vmul.f32 0.5, %v1215_v43  ;;  %v2081_v42 = vld [vmem:[#allocation2 + $0xe8] sm:$0xff]  ;;  %v2084_v43 = vld [vmem:[#allocation2 + $0xf0] sm:$0xff] }
 0x2e8   :  { %v639_v48 = vmul.f32 0.5, %v1217_v46  ;;  %1220 = vtanh.f32 %v632_v45  ;;  %v2087_v45 = vld [vmem:[#allocation2 + $0xf8] sm:$0xff]  ;;  %v2090_v46 = vld [vmem:[#allocation2 + $0xc0] sm:$0xff] }
 0x2e9   :  { %v638_v50 = vadd.f32 0.5, %v637_v47  ;;  %2401 = vst [vmem:[#allocation30_spill] sm:$0xff] %v2090_v46  ;;  %v2093_v47 = vld [vmem:[#allocation2 + $0xc8] sm:$0xff] }
 0x2ea   :  { %v640_v49 = vadd.f32 0.5, %v639_v48  ;;  %2402 = vst [vmem:[#allocation8_spill] sm:$0xff] %v2093_v47  ;;  %v2096_v48 = vld [vmem:[#allocation2 + $0xd0] sm:$0xff] }
 0x2eb   :  { %2403 = vst [vmem:[#allocation9_spill] sm:$0xff] %v2096_v48 }
 0x2ec   :  { %v646_v53 = vmul.f32 %v644_v51, %v640_v49  ;;  %v2099_v49 = vld [vmem:[#allocation2 + $0xd8] sm:$0xff]  ;;  %v2105_v51 = vld [vmem:[#allocation2 + $0xa8] sm:$0xff] }
 0x2ed   :  { %v1219_v52 = vpop.eup %1218  ;;  %2404 = vst [vmem:[#allocation10_spill] sm:$0xff] %v2099_v49 }
 0x2ee   :  { %v647_v10 = vmul.f32 %v1219_v52, %v638_v50  ;;  %v1221_v11 = vpop.eup %1220  ;;  %v2102_v50 = vld [vmem:[#allocation2 + $0xa0] sm:$0xff]  ;;  %2406 = vst [vmem:[#allocation12_spill] sm:$0xff] %v2105_v51  ;;  %v2108_v52 = vld [vmem:[#allocation2 + $0xb0] sm:$0xff] }
 0x2ef   :  { %v641_v13 = vmul.f32 0.5, %v1221_v11  ;;  %2405 = vst [vmem:[#allocation11_spill] sm:$0xff] %v2102_v50  ;;  %v2117_v11 = vld [vmem:[#allocation2 + $0x88] sm:$0xff] }
 0x2f0   :  { %v1981_v12 = vadd.f32 %v647_v10, %v646_v53  ;;  %2407 = vst [vmem:[#allocation13_spill] sm:$0xff] %v2108_v52  ;;  %v2111_v53 = vld [vmem:[#allocation2 + $0xb8] sm:$0xff]  ;;  %v2114_v10 = vld [vmem:[#allocation2 + $0x80] sm:$0xff] }
 0x2f1   :  { %v642_v14 = vadd.f32 0.5, %v641_v13  ;;  %2408 = vst [vmem:[#allocation14_spill] sm:$0xff] %v2111_v53  ;;  %v2120_v13 = vld [vmem:[#allocation2 + $0x90] sm:$0xff] }
 0x2f2   :  { %1222 = vtanh.f32 %v1981_v12  ;;  %2409 = vst [vmem:[#allocation15_spill] sm:$0xff] %v2114_v10 }
 0x2f3   :  { %2410 = vst [vmem:[#allocation16_spill] sm:$0xff] %v2117_v11 }
 0x2f4   :  { %2411 = vst [vmem:[#allocation17_spill] sm:$0xff] %v2120_v13 }
 0x2f8   :  { %v1223_v15 = vpop.eup %1222 }
 0x2f9   :  { %v650_v16 = vmul.f32 %v1223_v15, %v642_v14  ;;  %v2123_v14 = vld [vmem:[#allocation2 + $0x98] sm:$0xff]  ;;  %v2126_v15 = vld [vmem:[#allocation2 + $0x60] sm:$0xff] }
 0x2fa   :  { %2412 = vst [vmem:[#allocation18_spill] sm:$0xff] %v2123_v14 }
 0x2fb   :  { %v652_v17 = vrot.slane %v650_v16, 3  ;;  %2413 = vst [vmem:[#allocation19_spill] sm:$0xff] %v2126_v15  ;;  %v2129_v16 = vld [vmem:[#allocation2 + $0x68] sm:$0xff] }
 0x2fc   :  { %2414 = vst [vmem:[#allocation20_spill] sm:$0xff] %v2129_v16 }
 0x2fd   :  { %670 = vmatmul.f32.vlgmr.msrb.gmra.mxu0 %v652_v17  ;;  %690 = vmatmul.f32.vlgmr.msrb.gmra.mxu1 %v652_v17 }
 0x2fe   :  { %710 = vmatmul.f32.vlgmr.msrb.gmra.mxu2 %v652_v17  ;;  %730 = vmatmul.f32.vlgmr.msrb.gmra.mxu3 %v652_v17  ;;  %v2132_v17 = vld [vmem:[#allocation2 + $0x70] sm:$0xff] }
 0x2ff   :  { %888 = vmatpush.msrb.mxu0 %v1886_v54  ;;  %908 = vmatpush.msrb.mxu1 %v1889_v4  ;;  %2415 = vst [vmem:[#allocation21_spill] sm:$0xff] %v2132_v17 }
 0x300   :  { %928 = vmatpush.msrb.mxu2 %v1892_v57  ;;  %948 = vmatpush.msrb.mxu3 %v1895_v58 }
 0x301   :  { %889 = vmatpush.msrb.mxu0 %v1898_v3  ;;  %909 = vmatpush.msrb.mxu1 %v1901_v61 }
 0x302   :  { %929 = vmatpush.msrb.mxu2 %v1904_v63  ;;  %949 = vmatpush.msrb.mxu3 %v1907_v7 }
 0x303   :  { %890 = vmatpush.msrb.mxu0 %v1910_v62  ;;  %910 = vmatpush.msrb.mxu1 %v1913_v5 }
 0x304   :  { %930 = vmatpush.msrb.mxu2 %v1916_v59  ;;  %950 = vmatpush.msrb.mxu3 %v1919_v1 }
 0x305   :  { %891 = vmatpush.msrb.mxu0 %v1922_v6  ;;  %911 = vmatpush.msrb.mxu1 %v1997_v18 }
 0x306   :  { %931 = vmatpush.msrb.mxu2 %v2000_v19  ;;  %951 = vmatpush.msrb.mxu3 %v2003_v20 }
 0x307   :  { %892 = vmatpush.msrb.mxu0 %v2006_v21  ;;  %912 = vmatpush.msrb.mxu1 %v2009_v22 }
 0x308   :  { %932 = vmatpush.msrb.mxu2 %v2012_v9  ;;  %952 = vmatpush.msrb.mxu3 %v2015_v8 }
 0x309   :  { %893 = vmatpush.msrb.mxu0 %v2018_v60  ;;  %913 = vmatpush.msrb.mxu1 %v2021_v0 }
 0x30a   :  { %933 = vmatpush.msrb.mxu2 %v2024_v55  ;;  %953 = vmatpush.msrb.mxu3 %v2027_v2 }
 0x30b   :  { %894 = vmatpush.msrb.mxu0 %v2030_v23  ;;  %914 = vmatpush.msrb.mxu1 %v2033_v24 }
 0x30c   :  { %934 = vmatpush.msrb.mxu2 %v2036_v25  ;;  %954 = vmatpush.msrb.mxu3 %v2039_v26 }
 0x30d   :  { %895 = vmatpush.msrb.mxu0 %v2042_v27  ;;  %915 = vmatpush.msrb.mxu1 %v2045_v28 }
 0x30e   :  { %935 = vmatpush.msrb.mxu2 %v2048_v29  ;;  %955 = vmatpush.msrb.mxu3 %v2051_v30 }
 0x30f   :  { %896 = vmatpush.msrb.mxu0 %v2054_v31  ;;  %916 = vmatpush.msrb.mxu1 %v2057_v32 }
 0x310   :  { %936 = vmatpush.msrb.mxu2 %v2060_v33  ;;  %956 = vmatpush.msrb.mxu3 %v2063_v35 }
 0x311   :  { %897 = vmatpush.msrb.mxu0 %v2066_v37  ;;  %917 = vmatpush.msrb.mxu1 %v2069_v38 }
 0x312   :  { %937 = vmatpush.msrb.mxu2 %v2072_v39  ;;  %957 = vmatpush.msrb.mxu3 %v2075_v40 }
 0x313   :  { %898 = vmatpush.msrb.mxu0 %v2078_v41  ;;  %918 = vmatpush.msrb.mxu1 %v2081_v42 }
 0x314   :  { %938 = vmatpush.msrb.mxu2 %v2084_v43  ;;  %958 = vmatpush.msrb.mxu3 %v2087_v45 }
 0x315   :  { %899 = vmatpush.msrb.mxu0 %v2090_v46  ;;  %919 = vmatpush.msrb.mxu1 %v2093_v47 }
 0x316   :  { %939 = vmatpush.msrb.mxu2 %v2096_v48  ;;  %959 = vmatpush.msrb.mxu3 %v2099_v49 }
 0x317   :  { %900 = vmatpush.msrb.mxu0 %v2102_v50  ;;  %920 = vmatpush.msrb.mxu1 %v2105_v51 }
 0x318   :  { %940 = vmatpush.msrb.mxu2 %v2108_v52  ;;  %960 = vmatpush.msrb.mxu3 %v2111_v53 }
 0x319   :  { %901 = vmatpush.msrb.mxu0 %v2114_v10  ;;  %921 = vmatpush.msrb.mxu1 %v2117_v11  ;;  %v2135_v11 = vld [vmem:[#allocation2 + $0x78] sm:$0xff] }
 0x31a   :  { %941 = vmatpush.msrb.mxu2 %v2120_v13  ;;  %961 = vmatpush.msrb.mxu3 %v2123_v14  ;;  %2416 = vst [vmem:[#allocation22_spill] sm:$0xff] %v2135_v11  ;;  %v2138_v13 = vld [vmem:[#allocation2 + $0x40] sm:$0xff]  ;;  %v2141_v14 = vld [vmem:[#allocation2 + $0x48] sm:$0xff] }
 0x31b   :  { %902 = vmatpush.msrb.mxu0 %v2126_v15  ;;  %922 = vmatpush.msrb.mxu1 %v2129_v16  ;;  %2417 = vst [vmem:[#allocation23_spill] sm:$0xff] %v2138_v13  ;;  %v2144_v15 = vld [vmem:[#allocation2 + $0x50] sm:$0xff]  ;;  %v2147_v16 = vld [vmem:[#allocation2 + $0x58] sm:$0xff] }
 0x31c   :  { %942 = vmatpush.msrb.mxu2 %v2132_v17  ;;  %962 = vmatpush.msrb.mxu3 %v2135_v11  ;;  %2418 = vst [vmem:[#allocation24_spill] sm:$0xff] %v2141_v14 }
 0x31d   :  { %903 = vmatpush.msrb.mxu0 %v2138_v13  ;;  %923 = vmatpush.msrb.mxu1 %v2141_v14  ;;  %2419 = vst [vmem:[#allocation25_spill] sm:$0xff] %v2144_v15 }
 0x31e   :  { %943 = vmatpush.msrb.mxu2 %v2144_v15  ;;  %2420 = vst [vmem:[#allocation26_spill] sm:$0xff] %v2147_v16  ;;  %963 = vmatpush.msrb.mxu3 %v2147_v16 }
 0x37a   :  { %v671_v17 = vpop.f32.mrf.mxu0  ;;  %v691_v10 = vpop.f32.mrf.mxu1 }
 0x37b   :  { %v738_v53 = vrot.slane %v671_v17, 4  ;;  %v739_v11 = vrot.slane %v691_v10, 4 }
 0x37d   :  { %v746_v52 = vadd.f32 %v738_v53, %v2398_v34  ;;  %v747_v13 = vadd.f32 %v739_v11, %v2399_v36  ;;  %v761_v11 = vrot.slane %v1981_v12, 7  ;;  %v2437_v12 = vld [vmem:[#allocation23_spill] sm:$0xff] }
 0x37f   :  { %1224 = vtanh.f32 %v746_v52 }
 0x380   :  { %1226 = vtanh.f32 %v747_v13 }
 0x381   :  { %v711_v51 = vpop.f32.mrf.mxu2  ;;  %v731_v14 = vpop.f32.mrf.mxu3 }
 0x382   :  { %v740_v50 = vrot.slane %v711_v51, 4  ;;  %v741_v49 = vrot.slane %v731_v14, 4 }
 0x384   :  { %v748_v15 = vadd.f32 %v740_v50, %v2367_v56  ;;  %v749_v47 = vadd.f32 %v741_v49, %v2400_v44 }
 0x385   :  { %v1225_v48 = vpop.eup %1224 }
 0x386   :  { %v1227_v16 = vpop.eup %1226  ;;  %1228 = vtanh.f32 %v748_v15  ;;  %v754_v46 = vmul.f32 0.5, %v1225_v48 }
 0x387   :  { %v756_v17 = vmul.f32 0.5, %v1227_v16  ;;  %1230 = vtanh.f32 %v749_v47 }
 0x388   :  { %v755_v53 = vadd.f32 0.5, %v754_v46 }
 0x389   :  { %v757_v10 = vadd.f32 0.5, %v756_v17 }
 0x38b   :  { %v763_v13 = vmul.f32 %v761_v11, %v757_v10 }
 0x38c   :  { %v1229_v52 = vpop.eup %1228 }
 0x38d   :  { %v764_v36 = vmul.f32 %v1229_v52, %v755_v53  ;;  %v1231_v34 = vpop.eup %1230 }
 0x38e   :  { %v758_v50 = vmul.f32 0.5, %v1231_v34  ;;  %v2434_v34 = vld [vmem:[#allocation20_spill] sm:$0xff] }
 0x38f   :  { %v2155_v51 = vadd.f32 %v764_v36, %v763_v13  ;;  %v2435_v36 = vld [vmem:[#allocation21_spill] sm:$0xff] }
 0x390   :  { %v759_v14 = vadd.f32 0.5, %v758_v50 }
 0x391   :  { %1232 = vtanh.f32 %v2155_v51 }
 0x397   :  { %v1233_v49 = vpop.eup %1232 }
 0x398   :  { %v767_v44 = vmul.f32 %v1233_v49, %v759_v14 }
 0x39a   :  { %v769_v15 = vrot.slane %v767_v44, 4  ;;  %v2436_v44 = vld [vmem:[#allocation22_spill] sm:$0xff] }
 0x39c   :  { %787 = vmatmul.f32.vlgmr.msra.gmra.mxu0 %v769_v15  ;;  %807 = vmatmul.f32.vlgmr.msra.gmra.mxu1 %v769_v15 }
 0x39d   :  { %827 = vmatmul.f32.vlgmr.msra.gmra.mxu2 %v769_v15  ;;  %847 = vmatmul.f32.vlgmr.msra.gmra.mxu3 %v769_v15 }
 0x39e   :  { %1005 = vmatpush.msra.mxu0 %v1886_v54  ;;  %1025 = vmatpush.msra.mxu1 %v1889_v4  ;;  %v2421_v54 = vld [vmem:[#allocation30_spill] sm:$0xff]  ;;  %v2422_v4 = vld [vmem:[#allocation8_spill] sm:$0xff] }
 0x39f   :  { %1045 = vmatpush.msra.mxu2 %v1892_v57  ;;  %1065 = vmatpush.msra.mxu3 %v1895_v58  ;;  %v2423_v57 = vld [vmem:[#allocation9_spill] sm:$0xff]  ;;  %v2424_v58 = vld [vmem:[#allocation10_spill] sm:$0xff] }
 0x3a0   :  { %1006 = vmatpush.msra.mxu0 %v1898_v3  ;;  %1026 = vmatpush.msra.mxu1 %v1901_v61  ;;  %v2425_v3 = vld [vmem:[#allocation11_spill] sm:$0xff]  ;;  %v2426_v61 = vld [vmem:[#allocation12_spill] sm:$0xff] }
 0x3a1   :  { %1046 = vmatpush.msra.mxu2 %v1904_v63  ;;  %1066 = vmatpush.msra.mxu3 %v1907_v7  ;;  %v2427_v63 = vld [vmem:[#allocation13_spill] sm:$0xff]  ;;  %v2428_v7 = vld [vmem:[#allocation14_spill] sm:$0xff] }
 0x3a2   :  { %1007 = vmatpush.msra.mxu0 %v1910_v62  ;;  %1027 = vmatpush.msra.mxu1 %v1913_v5  ;;  %v2429_v62 = vld [vmem:[#allocation15_spill] sm:$0xff]  ;;  %v2430_v5 = vld [vmem:[#allocation16_spill] sm:$0xff] }
 0x3a3   :  { %1047 = vmatpush.msra.mxu2 %v1916_v59  ;;  %1067 = vmatpush.msra.mxu3 %v1919_v1  ;;  %v2431_v59 = vld [vmem:[#allocation17_spill] sm:$0xff]  ;;  %v2432_v1 = vld [vmem:[#allocation18_spill] sm:$0xff] }
 0x3a4   :  { %1008 = vmatpush.msra.mxu0 %v1922_v6  ;;  %1028 = vmatpush.msra.mxu1 %v1997_v18  ;;  %v2433_v6 = vld [vmem:[#allocation19_spill] sm:$0xff]  ;;  %v2438_v18 = vld [vmem:[#allocation24_spill] sm:$0xff] }
 0x3a5   :  { %1048 = vmatpush.msra.mxu2 %v2000_v19  ;;  %1068 = vmatpush.msra.mxu3 %v2003_v20  ;;  %v2439_v19 = vld [vmem:[#allocation25_spill] sm:$0xff]  ;;  %v2440_v20 = vld [vmem:[#allocation26_spill] sm:$0xff] }
 0x3a6   :  { %1009 = vmatpush.msra.mxu0 %v2006_v21  ;;  %1029 = vmatpush.msra.mxu1 %v2009_v22 }
 0x3a7   :  { %1049 = vmatpush.msra.mxu2 %v2012_v9  ;;  %1069 = vmatpush.msra.mxu3 %v2015_v8 }
 0x3a8   :  { %1010 = vmatpush.msra.mxu0 %v2018_v60  ;;  %1030 = vmatpush.msra.mxu1 %v2021_v0  ;;  %v2441_v60 = vld [vmem:[#allocation28_spill] sm:$0xff] }
 0x3a9   :  { %1050 = vmatpush.msra.mxu2 %v2024_v55  ;;  %1070 = vmatpush.msra.mxu3 %v2027_v2  ;;  %v2442_v55 = vld [vmem:[#allocation29_spill] sm:$0xff] }
 0x3aa   :  { %1011 = vmatpush.msra.mxu0 %v2030_v23  ;;  %1031 = vmatpush.msra.mxu1 %v2033_v24 }
 0x3ab   :  { %1051 = vmatpush.msra.mxu2 %v2036_v25  ;;  %1071 = vmatpush.msra.mxu3 %v2039_v26 }
 0x3ac   :  { %1012 = vmatpush.msra.mxu0 %v2042_v27  ;;  %1032 = vmatpush.msra.mxu1 %v2045_v28 }
 0x3ad   :  { %1052 = vmatpush.msra.mxu2 %v2048_v29  ;;  %1072 = vmatpush.msra.mxu3 %v2051_v30  ;;  %v2443_v29 = vld [vmem:[#allocation31_spill] sm:$0xff] }
 0x3ae   :  { %1013 = vmatpush.msra.mxu0 %v2054_v31  ;;  %1033 = vmatpush.msra.mxu1 %v2057_v32 }
 0x3af   :  { %1053 = vmatpush.msra.mxu2 %v2060_v33  ;;  %1073 = vmatpush.msra.mxu3 %v2063_v35 }
 0x3b0   :  { %1014 = vmatpush.msra.mxu0 %v2066_v37  ;;  %1034 = vmatpush.msra.mxu1 %v2069_v38  ;;  %v878_v38 = vrot.slane %v2155_v51, 7 }
 0x3b1   :  { %1054 = vmatpush.msra.mxu2 %v2072_v39  ;;  %1074 = vmatpush.msra.mxu3 %v2075_v40 }
 0x3b2   :  { %1015 = vmatpush.msra.mxu0 %v2078_v41  ;;  %1035 = vmatpush.msra.mxu1 %v2081_v42 }
 0x3b3   :  { %1055 = vmatpush.msra.mxu2 %v2084_v43  ;;  %1075 = vmatpush.msra.mxu3 %v2087_v45 }
 0x3b4   :  { %1016 = vmatpush.msra.mxu0 %v2421_v54  ;;  %1036 = vmatpush.msra.mxu1 %v2422_v4 }
 0x3b5   :  { %1056 = vmatpush.msra.mxu2 %v2423_v57  ;;  %1076 = vmatpush.msra.mxu3 %v2424_v58 }
 0x3b6   :  { %1017 = vmatpush.msra.mxu0 %v2425_v3  ;;  %1037 = vmatpush.msra.mxu1 %v2426_v61 }
 0x3b7   :  { %1057 = vmatpush.msra.mxu2 %v2427_v63  ;;  %1077 = vmatpush.msra.mxu3 %v2428_v7 }
 0x3b8   :  { %1018 = vmatpush.msra.mxu0 %v2429_v62  ;;  %1038 = vmatpush.msra.mxu1 %v2430_v5 }
 0x3b9   :  { %1058 = vmatpush.msra.mxu2 %v2431_v59  ;;  %1078 = vmatpush.msra.mxu3 %v2432_v1 }
 0x3ba   :  { %1019 = vmatpush.msra.mxu0 %v2433_v6  ;;  %1039 = vmatpush.msra.mxu1 %v2434_v34 }
 0x3bb   :  { %1059 = vmatpush.msra.mxu2 %v2435_v36  ;;  %1079 = vmatpush.msra.mxu3 %v2436_v44 }
 0x3bc   :  { %1020 = vmatpush.msra.mxu0 %v2437_v12  ;;  %1040 = vmatpush.msra.mxu1 %v2438_v18 }
 0x3bd   :  { %1060 = vmatpush.msra.mxu2 %v2439_v19  ;;  %1080 = vmatpush.msra.mxu3 %v2440_v20  ;;  %v1120_v19 = vld [vmem:[#allocation2 + $0x280] sm:$0x3] }
 0x419   :  { %v788_v21 = vpop.f32.mrf.mxu0  ;;  %v808_v22 = vpop.f32.mrf.mxu1 }
 0x41a   :  { %v855_v9 = vrot.slane %v788_v21, 3  ;;  %v856_v8 = vrot.slane %v808_v22, 3  ;;  %v1119_v22 = vld [vmem:[#allocation2 + $0x260] sm:$0xff] }
 0x41c   :  { %v863_v0 = vadd.f32 %v855_v9, %v2441_v60  ;;  %v864_v2 = vadd.f32 %v856_v8, %v2442_v55 }
 0x41e   :  { %1234 = vtanh.f32 %v863_v0 }
 0x41f   :  { %1236 = vtanh.f32 %v864_v2 }
 0x420   :  { %v828_v23 = vpop.f32.mrf.mxu2  ;;  %v848_v24 = vpop.f32.mrf.mxu3 }
 0x421   :  { %v857_v25 = vrot.slane %v828_v23, 3  ;;  %v858_v26 = vrot.slane %v848_v24, 3 }
 0x423   :  { %v865_v27 = vadd.f32 %v857_v25, %v2367_v56  ;;  %v866_v30 = vadd.f32 %v858_v26, %v2443_v29 }
 0x424   :  { %v1235_v28 = vpop.eup %1234 }
 0x425   :  { %v1237_v31 = vpop.eup %1236  ;;  %1238 = vtanh.f32 %v865_v27  ;;  %v871_v32 = vmul.f32 0.5, %v1235_v28 }
 0x426   :  { %v873_v33 = vmul.f32 0.5, %v1237_v31  ;;  %1240 = vtanh.f32 %v866_v30 }
 0x427   :  { %v872_v37 = vadd.f32 0.5, %v871_v32 }
 0x428   :  { %v874_v35 = vadd.f32 0.5, %v873_v33 }
 0x42a   :  { %v880_v40 = vmul.f32 %v878_v38, %v874_v35 }
 0x42b   :  { %v1239_v39 = vpop.eup %1238 }
 0x42c   :  { %v881_v41 = vmul.f32 %v1239_v39, %v872_v37  ;;  %v1241_v42 = vpop.eup %1240 }
 0x42d   :  { %v875_v45 = vmul.f32 0.5, %v1241_v42 }
 0x42e   :  { %v882_v43 = vadd.f32 %v881_v41, %v880_v40 }
 0x42f   :  { %v876_v46 = vadd.f32 0.5, %v875_v45 }
 0x430   :  { %1242 = vtanh.f32 %v882_v43  ;;  %v995_v7 = vrot.slane %v882_v43, 7 }
 0x436   :  { %v1243_v47 = vpop.eup %1242 }
 0x437   :  { %v884_v48 = vmul.f32 %v1243_v47, %v876_v46  ;;  %v1121_v46 = vld [vmem:[#allocation2 + $0x2a0] ss:$0 sm:$0xff] }
 0x439   :  { %v886_v16 = vrot.slane %v884_v48, 5 }
 0x43b   :  { %904 = vmatmul.f32.vlgmr.msrb.gmra.mxu0 %v886_v16  ;;  %924 = vmatmul.f32.vlgmr.msrb.gmra.mxu1 %v886_v16 }
 0x43c   :  { %944 = vmatmul.f32.vlgmr.msrb.gmra.mxu2 %v886_v16  ;;  %964 = vmatmul.f32.vlgmr.msrb.gmra.mxu3 %v886_v16 }
 0x43d   :  { %1175 = vmatpush.msk.msrb.mxu0 %vm1127_vm2, %v1120_v19 }
 0x43f   :  { %1146 = vmatpush.msrb.mxu0 %v1119_v22 }
 0x4b8   :  { %v905_v17 = vpop.f32.mrf.mxu0  ;;  %v925_v10 = vpop.f32.mrf.mxu1 }
 0x4b9   :  { %v972_v53 = vrot.slane %v905_v17, 2  ;;  %v973_v11 = vrot.slane %v925_v10, 2 }
 0x4bb   :  { %v980_v52 = vadd.f32 %v972_v53, %v2441_v60  ;;  %v981_v13 = vadd.f32 %v973_v11, %v2442_v55 }
 0x4bd   :  { %1244 = vtanh.f32 %v980_v52 }
 0x4be   :  { %1246 = vtanh.f32 %v981_v13 }
 0x4bf   :  { %v945_v51 = vpop.f32.mrf.mxu2  ;;  %v965_v50 = vpop.f32.mrf.mxu3 }
 0x4c0   :  { %v974_v14 = vrot.slane %v945_v51, 2  ;;  %v975_v49 = vrot.slane %v965_v50, 2 }
 0x4c2   :  { %v982_v15 = vadd.f32 %v974_v14, %v2367_v56  ;;  %v983_v4 = vadd.f32 %v975_v49, %v2443_v29 }
 0x4c3   :  { %v1245_v54 = vpop.eup %1244 }
 0x4c4   :  { %v1247_v57 = vpop.eup %1246  ;;  %1248 = vtanh.f32 %v982_v15  ;;  %v988_v58 = vmul.f32 0.5, %v1245_v54 }
 0x4c5   :  { %v990_v3 = vmul.f32 0.5, %v1247_v57  ;;  %1250 = vtanh.f32 %v983_v4 }
 0x4c6   :  { %v989_v63 = vadd.f32 0.5, %v988_v58 }
 0x4c7   :  { %v991_v61 = vadd.f32 0.5, %v990_v3 }
 0x4c9   :  { %v997_v5 = vmul.f32 %v995_v7, %v991_v61 }
 0x4ca   :  { %v1249_v62 = vpop.eup %1248 }
 0x4cb   :  { %v998_v59 = vmul.f32 %v1249_v62, %v989_v63  ;;  %v1251_v1 = vpop.eup %1250 }
 0x4cc   :  { %v992_v34 = vmul.f32 0.5, %v1251_v1 }
 0x4cd   :  { %v999_v6 = vadd.f32 %v998_v59, %v997_v5 }
 0x4ce   :  { %v993_v36 = vadd.f32 0.5, %v992_v34 }
 0x4cf   :  { %1252 = vtanh.f32 %v999_v6  ;;  %v1112_v37 = vrot.slane %v999_v6, 7 }
 0x4d5   :  { %v1253_v44 = vpop.eup %1252 }
 0x4d6   :  { %v1001_v12 = vmul.f32 %v1253_v44, %v993_v36 }
 0x4d8   :  { %v1003_v18 = vrot.slane %v1001_v12, 6 }
 0x4da   :  { %1021 = vmatmul.f32.vlgmr.msra.gmra.mxu0 %v1003_v18  ;;  %1041 = vmatmul.f32.vlgmr.msra.gmra.mxu1 %v1003_v18 }
 0x4db   :  { %1061 = vmatmul.f32.vlgmr.msra.gmra.mxu2 %v1003_v18  ;;  %1081 = vmatmul.f32.vlgmr.msra.gmra.mxu3 %v1003_v18 }
 0x557   :  { %v1022_v20 = vpop.f32.mrf.mxu0  ;;  %v1042_v21 = vpop.f32.mrf.mxu1 }
 0x558   :  { %v1089_v9 = vrot.slane %v1022_v20, 1  ;;  %v1090_v8 = vrot.slane %v1042_v21, 1 }
 0x55a   :  { %v1097_v0 = vadd.f32 %v1089_v9, %v2441_v60  ;;  %v1098_v2 = vadd.f32 %v1090_v8, %v2442_v55 }
 0x55c   :  { %1254 = vtanh.f32 %v1097_v0 }
 0x55d   :  { %1256 = vtanh.f32 %v1098_v2 }
 0x55e   :  { %v1062_v23 = vpop.f32.mrf.mxu2  ;;  %v1082_v24 = vpop.f32.mrf.mxu3 }
 0x55f   :  { %v1091_v25 = vrot.slane %v1062_v23, 1  ;;  %v1092_v26 = vrot.slane %v1082_v24, 1 }
 0x561   :  { %v1099_v27 = vadd.f32 %v1091_v25, %v2367_v56  ;;  %v1100_v30 = vadd.f32 %v1092_v26, %v2443_v29 }
 0x562   :  { %v1255_v28 = vpop.eup %1254 }
 0x563   :  { %v1257_v31 = vpop.eup %1256  ;;  %1258 = vtanh.f32 %v1099_v27  ;;  %v1105_v32 = vmul.f32 0.5, %v1255_v28 }
 0x564   :  { %v1107_v33 = vmul.f32 0.5, %v1257_v31  ;;  %1260 = vtanh.f32 %v1100_v30 }
 0x565   :  { %v1106_v60 = vadd.f32 0.5, %v1105_v32 }
 0x566   :  { %v1108_v35 = vadd.f32 0.5, %v1107_v33 }
 0x568   :  { %v1114_v38 = vmul.f32 %v1112_v37, %v1108_v35 }
 0x569   :  { %v1259_v55 = vpop.eup %1258 }
 0x56a   :  { %v1115_v39 = vmul.f32 %v1259_v55, %v1106_v60  ;;  %v1261_v40 = vpop.eup %1260 }
 0x56b   :  { %v1109_v42 = vmul.f32 0.5, %v1261_v40 }
 0x56c   :  { %v1116_v41 = vadd.f32 %v1115_v39, %v1114_v38 }
 0x56d   :  { %v1110_v43 = vadd.f32 0.5, %v1109_v42 }
 0x56e   :  { %1262 = vtanh.f32 %v1116_v41 }
 0x574   :  { %v1263_v56 = vpop.eup %1262 }
 0x575   :  { %v1118_v45 = vmul.f32 %v1263_v56, %v1110_v43 }
 0x577   :  { %v1123_v29 = vrot.slane %v1118_v45, 7 }
 0x579   :  { %1176 = vmatmul.msk.f32.vlgmr.msrb.gmra.mxu0 %vm1124_vm3, %v1123_v29 }
 0x5f6   :  { %v1148_v47 = vpop.f32.mrf.mxu0 }
 0x5f7   :  { %v1149_v48 = vadd.f32 %v1148_v47, %v1121_v46 }
 0x5f9   :  { %1152 = vst.msk [vmem:[#allocation5] sm:$0x1] %vm1151_vm4, %v1149_v48 }
 0x5fa   :  { %1163 = dma.vmem_to_hbm [thread:$0]  %s1159_s1, 16, %s1161_s20, [#allocation4]  }
 0x5fb   :  { %1378 = dma.done.wait [#allocation4], 16  }
 0x5fc   :  { %1379 = vsyncadd [#allocation4], 4294967280 }
 0x5fd   :  { %1168 = vsyncpa [#allocation3], 1 }
 0x5fe   :  { %1169 = vsyncpa [#allocation4], 1 }

</bundles_post_ra>
